<compile_context>
chip_gen: v7x
topology: tpu7x:2x2x1
jax: 0.10.0
libtpu: 0.0.40
codegen_flags: <defaults>
</compile_context>

<pallas_src>
import functools

import numpy as np
import jax
import jax.numpy as jnp
from jax import lax
from jax.experimental import pallas as pl
from jax.experimental.pallas import tpu as pltpu

K1, K2, STRIDE = 5, 5, 2   # conv1 kernel/stride, conv2 kernel
H_IN = 32                  # inMLP hidden width
C1 = 32                    # conv1 out channels
C2 = 16                    # conv2 out channels
H_OUT = 32                 # outMLP hidden width


def timecnn_kernel(x_ref, w1_ref, w2_ref, wc1_ref, wc2_ref, w3_ref, w4_ref,
                   b_ref, out_ref, *, SH, L1C, L2C, EP, compute_dtype):
    f32 = jnp.float32
    x = x_ref[...]                                          # (TB, S*F)

    # inMLP layer 1: block-diagonal (S*F, S*32) weight (position-wise Linear).
    h = jnp.dot(x, w1_ref[...], preferred_element_type=f32)
    h = jnp.tanh(h + b_ref[0:1, :SH]).astype(compute_dtype)

    # inMLP layer 2: block-diagonal (S*32, S*32).
    h = jnp.dot(h, w2_ref[...], preferred_element_type=f32)
    h = jnp.tanh(h + b_ref[1:2, :SH]).astype(compute_dtype)

    # Conv1d(32 -> 32, k=5, stride=2): one banded (S*32, L1*32) matmul.
    c1 = jnp.dot(h, wc1_ref[...], preferred_element_type=f32)
    c1 = (c1 + b_ref[2:3, :L1C]).astype(compute_dtype)

    # Conv1d(32 -> 16, k=5, stride=1): one banded (L1*32, L2*16) matmul.
    c2 = jnp.dot(c1, wc2_ref[...], preferred_element_type=f32)
    c2 = (c2 + b_ref[3:4, :L2C]).astype(compute_dtype)

    # outMLP layer 1 (W3 rows pre-permuted to match torch flatten(1) ordering).
    h3 = jnp.dot(c2, w3_ref[...], preferred_element_type=f32)
    h3 = jnp.tanh(h3 + b_ref[4:5, :H_OUT]).astype(compute_dtype)

    # outMLP layer 2, lane-dense padded output (EP is a multiple of 128).
    out = jnp.dot(h3, w4_ref[...], preferred_element_type=f32)
    out_ref[...] = (out + b_ref[5:6, :EP]).astype(out_ref.dtype)


def _pick_batch_tile(B, max_tb):
    """Batch tile: multiple of 8 and >= 2 grid steps whenever B > 8."""
    if B <= 8:
        return B
    tb = ((pl.cdiv(B, 2) + 7) // 8) * 8
    return int(min(max_tb, tb))


def _banded_conv_weight(w, in_len, out_len, stride):
    """Conv1d weight (Cout, Cin, K) -> banded (in_len*Cin, out_len*Cout) matrix
    so out[b, l*Cout+co] = sum_{k,ci} h[b, (stride*l+k)*Cin+ci] * w[co, ci, k]."""
    _, cin, k = w.shape
    wk = jnp.transpose(w, (2, 1, 0))                        # (K, Cin, Cout)
    t = jnp.arange(in_len)[:, None, None]
    kk = jnp.arange(k)[None, :, None]
    ll = jnp.arange(out_len)[None, None, :]
    ind = (t == stride * ll + kk).astype(w.dtype)           # (in_len, K, out_len)
    return jnp.einsum('tkl,kcd->tcld', ind, wk).reshape(in_len * cin,
                                                        out_len * w.shape[0])


def timecnn_forward(x, params, *, compute_dtype=jnp.bfloat16, batch_tile=512):
    """x: (B, S, F) float32. params in PyTorch conventions (see init_params)."""
    B, S, F = x.shape
    L1 = (S - K1) // STRIDE + 1
    L2 = L1 - K2 + 1
    assert L1 >= 1 and L2 >= 1, "seq_len too short for the two Conv1d layers"

    (w_lin1, b_lin1, w_lin2, b_lin2, w_c1, b_c1, w_c2, b_c2,
     w_lin3, b_lin3, w_lin4, b_lin4) = params
    E = w_lin4.shape[0]
    EP = max(128, ((E + 127) // 128) * 128)                 # lane-dense output
    SH, L1C, L2C, SF = S * H_IN, L1 * C1, L2 * C2, S * F

    f32 = jnp.float32
    eye = jnp.eye(S, dtype=f32)
    # Block-diagonal position-wise MLP weights (x is flattened to (B, S*F)).
    w1bd = jnp.kron(eye, w_lin1.astype(f32).T)              # (S*F,  S*32)
    w2bd = jnp.kron(eye, w_lin2.astype(f32).T)              # (S*32, S*32)
    # Banded conv weights (time lives in the lane axis in blocks of 32 / 16).
    wc1b = _banded_conv_weight(w_c1.astype(f32), S, L1, STRIDE)   # (S*32, L1*32)
    wc2b = _banded_conv_weight(w_c2.astype(f32), L1, L2, 1)       # (L1*32, L2*16)
    # torch flatten(1) of (B, C2, L2) is j = c*L2 + m; kernel c2 ordering is
    # j' = m*C2 + c, so permute W3's input rows accordingly.
    w3k = (w_lin3.astype(f32).reshape(H_OUT, C2, L2)
           .transpose(2, 1, 0).reshape(L2C, H_OUT))
    w4k = jnp.pad(w_lin4.astype(f32).T, ((0, 0), (0, EP - E)))    # (32, EP)
    weights = [w.astype(compute_dtype) for w in (w1bd, w2bd, wc1b, wc2b, w3k, w4k)]

    # Biases pre-tiled to each stage's lane layout, packed in one f32 slab.
    WPAD = max(SH, EP)
    rows = [jnp.tile(b_lin1.astype(f32), S),
            jnp.tile(b_lin2.astype(f32), S),
            jnp.tile(b_c1.astype(f32), L1),
            jnp.tile(b_c2.astype(f32), L2),
            b_lin3.astype(f32),
            jnp.pad(b_lin4.astype(f32), (0, EP - E))]
    bslab = jnp.zeros((8, WPAD), f32)
    for i, r in enumerate(rows):
        bslab = bslab.at[i, :r.shape[0]].set(r)

    # Batch tiling: >= 2 grid steps when B > 8; pad B up to a tile multiple.
    TB = _pick_batch_tile(B, batch_tile)
    Bp = pl.cdiv(B, TB) * TB
    x2 = x.reshape(B, SF).astype(compute_dtype)
    if Bp != B:
        x2 = jnp.pad(x2, ((0, Bp - B), (0, 0)))

    kern = functools.partial(timecnn_kernel, SH=SH, L1C=L1C, L2C=L2C, EP=EP,
                             compute_dtype=compute_dtype)

    # VMEM budget: weights (conservatively double-buffered) + x/out blocks +
    # f32 intermediates; clamp to what every TPU generation can grant.
    itemsize = jnp.dtype(compute_dtype).itemsize
    w_bytes = sum(int(w.size) for w in weights) * itemsize + int(bslab.size) * 4
    blk_bytes = TB * SF * itemsize + TB * EP * 4
    inter_bytes = 4 * TB * (2 * SH + L1C + L2C + H_OUT + EP)
    vmem_limit = int(min(max(2 * (w_bytes + blk_bytes) + inter_bytes + (4 << 20),
                             32 << 20), 48 << 20))

    out = pl.pallas_call(
        kern,
        out_shape=jax.ShapeDtypeStruct((Bp, EP), f32),
        grid=(Bp // TB,),
        in_specs=[pl.BlockSpec((TB, SF), lambda i: (i, 0))]
                 + [pl.BlockSpec(w.shape, lambda i: (0, 0)) for w in weights]
                 + [pl.BlockSpec(bslab.shape, lambda i: (0, 0))],
        out_specs=pl.BlockSpec((TB, EP), lambda i: (i, 0)),
        compiler_params=pltpu.CompilerParams(
            dimension_semantics=("parallel",),
            vmem_limit_bytes=vmem_limit),
    )(x2, *weights, bslab)
    return out[:B, :E]


def init_params(key, in_feature_dim, param_embed_dim, seq_len):
    """Deterministic synthetic parameters, stored in PyTorch conventions."""
    L1 = (seq_len - K1) // STRIDE + 1
    L2 = L1 - K2 + 1
    flat = C2 * L2
    ks = jax.random.split(key, 8)

    def xavier(k, shape):  # shape = (out, in), xavier_normal-style std
        fan_out, fan_in = shape
        std = (2.0 / (fan_in + fan_out)) ** 0.5
        return std * jax.random.normal(k, shape, jnp.float32)

    w_lin1 = xavier(ks[0], (H_IN, in_feature_dim))
    b_lin1 = jnp.zeros((H_IN,), jnp.float32)
    w_lin2 = xavier(ks[1], (H_IN, H_IN))
    b_lin2 = jnp.zeros((H_IN,), jnp.float32)
    w_c1 = 0.1 * jax.random.normal(ks[2], (C1, H_IN, K1), jnp.float32)   # (out, in, k)
    b_c1 = 0.01 * jax.random.normal(ks[3], (C1,), jnp.float32)
    w_c2 = 0.1 * jax.random.normal(ks[4], (C2, C1, K2), jnp.float32)
    b_c2 = 0.01 * jax.random.normal(ks[5], (C2,), jnp.float32)
    w_lin3 = xavier(ks[6], (H_OUT, flat))
    b_lin3 = jnp.zeros((H_OUT,), jnp.float32)
    w_lin4 = xavier(ks[7], (param_embed_dim, H_OUT))
    b_lin4 = jnp.zeros((param_embed_dim,), jnp.float32)
    return (w_lin1, b_lin1, w_lin2, b_lin2, w_c1, b_c1, w_c2, b_c2,
            w_lin3, b_lin3, w_lin4, b_lin4)


def reference_forward(x, params):
    """Pure-JAX replica of the PyTorch forward (HIGHEST precision)."""
    hi = lax.Precision.HIGHEST
    (w1, b1, w2, b2, wc1, bc1, wc2, bc2, w3, b3, w4, b4) = params
    h = jnp.tanh(jnp.dot(x, w1.T, precision=hi) + b1)
    h = jnp.tanh(jnp.dot(h, w2.T, precision=hi) + b2)
    y = jnp.transpose(h, (0, 2, 1))                          # (B, 32, S), torch NCL
    y = lax.conv_general_dilated(y, wc1, window_strides=(STRIDE,), padding='VALID',
                                 dimension_numbers=('NCH', 'OIH', 'NCH'),
                                 precision=hi)
    y = y + bc1[None, :, None]
    y = lax.conv_general_dilated(y, wc2, window_strides=(1,), padding='VALID',
                                 dimension_numbers=('NCH', 'OIH', 'NCH'),
                                 precision=hi)
    y = y + bc2[None, :, None]
    flat = y.reshape(y.shape[0], -1)                         # torch flatten(1)
    h3 = jnp.tanh(jnp.dot(flat, w3.T, precision=hi) + b3)
    return jnp.dot(h3, w4.T, precision=hi) + b4


if __name__ == "__main__":
    B, F, S, E = 2, 8, 16, 6   # batch, in_feature_dim, seq_len, param_embed_dim
    key = jax.random.PRNGKey(0)
    kx, kp = jax.random.split(key)
    x = jax.random.normal(kx, (B, S, F), jnp.float32)
    params = init_params(kp, F, E, S)

    ref = reference_forward(x, params)

    # Exact-math check: f32 operands, tightened tolerance (validates the
    # block-diagonal / banded-weight structure and the W3 permutation).
    out_f32 = jax.block_until_ready(
        timecnn_forward(x, params, compute_dtype=jnp.float32))
    assert out_f32.shape == (B, E)
    np.testing.assert_allclose(np.asarray(out_f32), np.asarray(ref),
                               rtol=2e-4, atol=2e-4)

    # Default fast path: bf16 operands on the MXU (f32 accumulation); looser
    # tolerance covers input/weight/activation quantization drift.
    out_bf16 = jax.block_until_ready(timecnn_forward(x, params))
    assert out_bf16.shape == (B, E)
    np.testing.assert_allclose(np.asarray(out_bf16), np.asarray(ref),
                               rtol=1e-1, atol=1e-1)

    print("KERNEL_OK")
</pallas_src>

<mosaic_0001>
module attributes {stable_mosaic.version = 11 : i64} {
  func.func @timecnn_kernel(%arg0: i32, %arg1: memref<2x128xf32, #tpu.memory_space<vmem>>, %arg2: memref<128x512xf32, #tpu.memory_space<vmem>>, %arg3: memref<512x512xf32, #tpu.memory_space<vmem>>, %arg4: memref<512x192xf32, #tpu.memory_space<vmem>>, %arg5: memref<192x32xf32, #tpu.memory_space<vmem>>, %arg6: memref<32x32xf32, #tpu.memory_space<vmem>>, %arg7: memref<32x128xf32, #tpu.memory_space<vmem>>, %arg8: memref<8x512xf32, #tpu.memory_space<vmem>>, %arg9: memref<2x128xf32, #tpu.memory_space<vmem>>) attributes {dimension_semantics = [#tpu.dimension_semantics<parallel>], iteration_bounds = array<i64: 1>, scalar_prefetch = 0 : i64, scratch_operands = 0 : i64, tpu.core_type = #tpu.core_type<tc>, window_params = [{transform_indices = @transform_0, window_bounds = array<i64: 2, 128>}, {pipeline_mode = #tpu.pipeline_mode<synchronous>, transform_indices = @transform_1, window_bounds = array<i64: 128, 512>}, {pipeline_mode = #tpu.pipeline_mode<synchronous>, transform_indices = @transform_2, window_bounds = array<i64: 512, 512>}, {pipeline_mode = #tpu.pipeline_mode<synchronous>, transform_indices = @transform_3, window_bounds = array<i64: 512, 192>}, {pipeline_mode = #tpu.pipeline_mode<synchronous>, transform_indices = @transform_4, window_bounds = array<i64: 192, 32>}, {pipeline_mode = #tpu.pipeline_mode<synchronous>, transform_indices = @transform_5, window_bounds = array<i64: 32, 32>}, {pipeline_mode = #tpu.pipeline_mode<synchronous>, transform_indices = @transform_6, window_bounds = array<i64: 32, 128>}, {pipeline_mode = #tpu.pipeline_mode<synchronous>, transform_indices = @transform_7, window_bounds = array<i64: 8, 512>}, {transform_indices = @transform_8, window_bounds = array<i64: 2, 128>}]} {
    %c0 = arith.constant 0 : index
    %c0_0 = arith.constant 0 : index
    %0 = vector.load %arg1[%c0, %c0_0] : memref<2x128xf32, #tpu.memory_space<vmem>>, vector<2x128xf32>
    %c0_1 = arith.constant 0 : index
    %c0_2 = arith.constant 0 : index
    %1 = vector.load %arg2[%c0_1, %c0_2] : memref<128x512xf32, #tpu.memory_space<vmem>>, vector<128x512xf32>
    %cst = arith.constant dense<0.000000e+00> : vector<2x512xf32>
    %2 = tpu.matmul %0, %1, %cst {dimension_numbers = #tpu.dot_dimension_numbers<[1], [0], [0], [1], [0, 0, 1, 1], [], []>} : vector<2x128xf32>, vector<128x512xf32>, vector<2x512xf32> -> vector<2x512xf32>
    %c0_3 = arith.constant 0 : index
    %c0_4 = arith.constant 0 : index
    %3 = vector.load %arg8[%c0_3, %c0_4] : memref<8x512xf32, #tpu.memory_space<vmem>>, vector<1x512xf32>
    %4 = vector.broadcast %3 : vector<1x512xf32> to vector<2x512xf32>
    %5 = arith.addf %2, %4 : vector<2x512xf32>
    %6 = math.tanh %5 : vector<2x512xf32>
    %c0_5 = arith.constant 0 : index
    %c0_6 = arith.constant 0 : index
    %7 = vector.load %arg3[%c0_5, %c0_6] : memref<512x512xf32, #tpu.memory_space<vmem>>, vector<512x512xf32>
    %cst_7 = arith.constant dense<0.000000e+00> : vector<2x512xf32>
    %8 = tpu.matmul %6, %7, %cst_7 {dimension_numbers = #tpu.dot_dimension_numbers<[1], [0], [0], [1], [0, 0, 1, 1], [], []>} : vector<2x512xf32>, vector<512x512xf32>, vector<2x512xf32> -> vector<2x512xf32>
    %c1 = arith.constant 1 : index
    %c0_8 = arith.constant 0 : index
    %9 = vector.load %arg8[%c1, %c0_8] : memref<8x512xf32, #tpu.memory_space<vmem>>, vector<1x512xf32>
    %10 = vector.broadcast %9 : vector<1x512xf32> to vector<2x512xf32>
    %11 = arith.addf %8, %10 : vector<2x512xf32>
    %12 = math.tanh %11 : vector<2x512xf32>
    %c0_9 = arith.constant 0 : index
    %c0_10 = arith.constant 0 : index
    %13 = vector.load %arg4[%c0_9, %c0_10] : memref<512x192xf32, #tpu.memory_space<vmem>>, vector<512x192xf32>
    %cst_11 = arith.constant dense<0.000000e+00> : vector<2x192xf32>
    %14 = tpu.matmul %12, %13, %cst_11 {dimension_numbers = #tpu.dot_dimension_numbers<[1], [0], [0], [1], [0, 0, 1, 1], [], []>} : vector<2x512xf32>, vector<512x192xf32>, vector<2x192xf32> -> vector<2x192xf32>
    %c2 = arith.constant 2 : index
    %c0_12 = arith.constant 0 : index
    %15 = vector.load %arg8[%c2, %c0_12] : memref<8x512xf32, #tpu.memory_space<vmem>>, vector<1x192xf32>
    %16 = vector.broadcast %15 : vector<1x192xf32> to vector<2x192xf32>
    %17 = arith.addf %14, %16 : vector<2x192xf32>
    %c0_13 = arith.constant 0 : index
    %c0_14 = arith.constant 0 : index
    %18 = vector.load %arg5[%c0_13, %c0_14] : memref<192x32xf32, #tpu.memory_space<vmem>>, vector<192x32xf32>
    %cst_15 = arith.constant dense<0.000000e+00> : vector<2x32xf32>
    %19 = tpu.matmul %17, %18, %cst_15 {dimension_numbers = #tpu.dot_dimension_numbers<[1], [0], [0], [1], [0, 0, 1, 1], [], []>} : vector<2x192xf32>, vector<192x32xf32>, vector<2x32xf32> -> vector<2x32xf32>
    %c3 = arith.constant 3 : index
    %c0_16 = arith.constant 0 : index
    %20 = vector.load %arg8[%c3, %c0_16] : memref<8x512xf32, #tpu.memory_space<vmem>>, vector<1x32xf32>
    %21 = vector.broadcast %20 : vector<1x32xf32> to vector<2x32xf32>
    %22 = arith.addf %19, %21 : vector<2x32xf32>
    %c0_17 = arith.constant 0 : index
    %c0_18 = arith.constant 0 : index
    %23 = vector.load %arg6[%c0_17, %c0_18] : memref<32x32xf32, #tpu.memory_space<vmem>>, vector<32x32xf32>
    %cst_19 = arith.constant dense<0.000000e+00> : vector<2x32xf32>
    %24 = tpu.matmul %22, %23, %cst_19 {dimension_numbers = #tpu.dot_dimension_numbers<[1], [0], [0], [1], [0, 0, 1, 1], [], []>} : vector<2x32xf32>, vector<32x32xf32>, vector<2x32xf32> -> vector<2x32xf32>
    %c4 = arith.constant 4 : index
    %c0_20 = arith.constant 0 : index
    %25 = vector.load %arg8[%c4, %c0_20] : memref<8x512xf32, #tpu.memory_space<vmem>>, vector<1x32xf32>
    %26 = vector.broadcast %25 : vector<1x32xf32> to vector<2x32xf32>
    %27 = arith.addf %24, %26 : vector<2x32xf32>
    %28 = math.tanh %27 : vector<2x32xf32>
    %c0_21 = arith.constant 0 : index
    %c0_22 = arith.constant 0 : index
    %29 = vector.load %arg7[%c0_21, %c0_22] : memref<32x128xf32, #tpu.memory_space<vmem>>, vector<32x128xf32>
    %cst_23 = arith.constant dense<0.000000e+00> : vector<2x128xf32>
    %30 = tpu.matmul %28, %29, %cst_23 {dimension_numbers = #tpu.dot_dimension_numbers<[1], [0], [0], [1], [0, 0, 1, 1], [], []>} : vector<2x32xf32>, vector<32x128xf32>, vector<2x128xf32> -> vector<2x128xf32>
    %c5 = arith.constant 5 : index
    %c0_24 = arith.constant 0 : index
    %31 = vector.load %arg8[%c5, %c0_24] : memref<8x512xf32, #tpu.memory_space<vmem>>, vector<1x128xf32>
    %32 = vector.broadcast %31 : vector<1x128xf32> to vector<2x128xf32>
    %33 = arith.addf %30, %32 : vector<2x128xf32>
    %c0_25 = arith.constant 0 : index
    %c0_26 = arith.constant 0 : index
    %34 = vector.load %arg9[%c0_25, %c0_26] : memref<2x128xf32, #tpu.memory_space<vmem>>, vector<2x128xf32>
    tpu.vector_store %arg9[%c0_25, %c0_26], %33 {strides = array<i32>} : memref<2x128xf32, #tpu.memory_space<vmem>>, vector<2x128xf32>,
    return
  }
  func.func @transform_0(%arg0: i32) -> (i32, i32) {
    %c0_i32 = arith.constant 0 : i32
    %c0_i32_0 = arith.constant 0 : i32
    return %arg0, %c0_i32 : i32, i32
  }
  func.func @transform_1(%arg0: i32) -> (i32, i32) {
    %c0_i32 = arith.constant 0 : i32
    %c0_i32_0 = arith.constant 0 : i32
    %c0_i32_1 = arith.constant 0 : i32
    return %c0_i32, %c0_i32_0 : i32, i32
  }
  func.func @transform_2(%arg0: i32) -> (i32, i32) {
    %c0_i32 = arith.constant 0 : i32
    %c0_i32_0 = arith.constant 0 : i32
    %c0_i32_1 = arith.constant 0 : i32
    return %c0_i32, %c0_i32_0 : i32, i32
  }
  func.func @transform_3(%arg0: i32) -> (i32, i32) {
    %c0_i32 = arith.constant 0 : i32
    %c0_i32_0 = arith.constant 0 : i32
    %c0_i32_1 = arith.constant 0 : i32
    return %c0_i32, %c0_i32_0 : i32, i32
  }
  func.func @transform_4(%arg0: i32) -> (i32, i32) {
    %c0_i32 = arith.constant 0 : i32
    %c0_i32_0 = arith.constant 0 : i32
    %c0_i32_1 = arith.constant 0 : i32
    return %c0_i32, %c0_i32_0 : i32, i32
  }
  func.func @transform_5(%arg0: i32) -> (i32, i32) {
    %c0_i32 = arith.constant 0 : i32
    %c0_i32_0 = arith.constant 0 : i32
    %c0_i32_1 = arith.constant 0 : i32
    return %c0_i32, %c0_i32_0 : i32, i32
  }
  func.func @transform_6(%arg0: i32) -> (i32, i32) {
    %c0_i32 = arith.constant 0 : i32
    %c0_i32_0 = arith.constant 0 : i32
    %c0_i32_1 = arith.constant 0 : i32
    return %c0_i32, %c0_i32_0 : i32, i32
  }
  func.func @transform_7(%arg0: i32) -> (i32, i32) {
    %c0_i32 = arith.constant 0 : i32
    %c0_i32_0 = arith.constant 0 : i32
    %c0_i32_1 = arith.constant 0 : i32
    return %c0_i32, %c0_i32_0 : i32, i32
  }
  func.func @transform_8(%arg0: i32) -> (i32, i32) {
    %c0_i32 = arith.constant 0 : i32
    %c0_i32_0 = arith.constant 0 : i32
    return %arg0, %c0_i32 : i32, i32
  }
}

</mosaic_0001>

<bundles_post_ra>
// kernel: tpu_custom_call.1
= control target key start
LH: loop header
LB: loop body
LE: loop exit
PB: predicated region body
PF: predicated region fallthrough
CT: control target
= control target key end

     0   :  { %13 = vsyncpa [#allocation3], 0  ;;  %s3550_s0 = inlined_call_operand.vmem [shape: f32[2,128], index: 0, kind: input, shape index: {}]   ;;  %s3551_s1 = inlined_call_operand.hbm [shape: f32[128,512], index: 1, kind: input, shape index: {}]   ;;  %s3552_s2 = inlined_call_operand.vmem [shape: f32[512,512], index: 2, kind: input, shape index: {}]   ;;  %s3553_s3 = inlined_call_operand.vmem [shape: f32[512,192], index: 3, kind: input, shape index: {}]   ;;  %s3554_s4 = inlined_call_operand.vmem [shape: f32[192,32], index: 4, kind: input, shape index: {}]   ;;  %s3555_s5 = inlined_call_operand.hbm [shape: f32[32,32], index: 5, kind: input, shape index: {}]   ;;  %s3556_s6 = inlined_call_operand.hbm [shape: f32[32,128], index: 6, kind: input, shape index: {}]   ;;  %s3557_s7 = inlined_call_operand.hbm [shape: f32[8,512], index: 7, kind: input, shape index: {}]   ;;  %s3558_s8 = inlined_call_operand.hbm [shape: f32[2,128], index: 8, kind: output, shape index: {}]  }
   0x1   :  { %14 = vsyncpa [#allocation6], 0 }
   0x2   :  { %15 = vsyncpa [#allocation9], 0 }
   0x3   :  { %16 = vsyncpa [#allocation4], 0  ;;  %s2132_s27 = smov [#allocation5]   ;;  %s2014_s9 = scalar_lea.hbm %s3555_s5, 512 }
   0x4   :  { %s42_s28 = sshll.u32 %s2132_s27, 4  ;;  %p2015_p0 = scmp.ne.s32.totalorder %s3555_s5, %s2014_s9  ;;  %s43_s28 = int_to_ptr.vmem [resolvable:$true] %s42_s28 }
   0x5   :  { %p2018_p1 = scmp.lt.u32.totalorder %s2014_s9, %s3555_s5 }
   0x7   :  { %p2020_p2 = pnand %p2018_p1, %p2015_p0 }
   0x9   :  { %2023 = shalt.err (!%p2020_p2)
}
   0xa   :  { %s2024_s14 = scalar_lea.vmem %s43_s28, 512  ;;  %p2029_p4 = scmp.lt.s32.totalorder %s43_s28, %s43_s28 }
   0xb   :  { %p2025_p3 = scmp.ne.s32.totalorder %s43_s28, %s2024_s14  ;;  %p2030_p5 = scmp.lt.s32.totalorder %s2024_s14, %s2024_s14 }
   0xd   :  { %p2031_p6 = por %p2030_p5, %p2029_p4 }
   0xf   :  { %p2032_p7 = pnand %p2031_p6, %p2025_p3 }
  0x11   :  { %2035 = shalt.err (!%p2032_p7)
}
  0x12   :  { %s2133_s15 = smov 128   ;;  %s2134_s16 = smov 8  }
  0x13   :  { %48 = dma.hbm_to_vmem [thread:$0]  %s3555_s5, 512, %s43_s28, [#allocation6], %s2133_s15, %s2133_s15, %s2134_s16  }
  0x14   :  { %s2135_s19 = smov [#allocation2]   ;;  %s2036_s23 = scalar_lea.hbm %s3551_s1, 8192 }
  0x15   :  { %s24_s20 = sshll.u32 %s2135_s19, 4  ;;  %p2037_p8 = scmp.ne.s32.totalorder %s3551_s1, %s2036_s23  ;;  %s25_s20 = int_to_ptr.vmem [resolvable:$true] %s24_s20 }
  0x16   :  { %p2040_p9 = scmp.lt.u32.totalorder %s2036_s23, %s3551_s1 }
  0x18   :  { %p2042_p10 = pnand %p2040_p9, %p2037_p8 }
  0x1a   :  { %2045 = shalt.err (!%p2042_p10)
}
  0x1b   :  { %s2046_s29 = scalar_lea.vmem %s25_s20, 8192  ;;  %p2051_p12 = scmp.lt.s32.totalorder %s25_s20, %s25_s20 }
  0x1c   :  { %p2047_p11 = scmp.ne.s32.totalorder %s25_s20, %s2046_s29  ;;  %p2052_p13 = scmp.lt.s32.totalorder %s2046_s29, %s2046_s29 }
  0x1e   :  { %p2053_p0 = por %p2052_p13, %p2051_p12 }
  0x20   :  { %p2054_p1 = pnand %p2053_p0, %p2047_p11 }
  0x22   :  { %2057 = shalt.err (!%p2054_p1)
}
  0x23   :  { %s2136_s5 = smov 512   ;;  %s2137_s28 = smov 32  }
  0x24   :  { %30 = dma.hbm_to_vmem [thread:$0]  %s3551_s1, 8192, %s25_s20, [#allocation3], %s2136_s5, %s2136_s5, %s2137_s28  }
  0x25   :  { %s2138_s10 = smov [#allocation7]   ;;  %s2139_s12 = smov [#allocation8]  }
  0x26   :  { %s54_s11 = sshll.u32 %s2138_s10, 4  ;;  %s67_s13 = sshll.u32 %s2139_s12, 4  ;;  %s55_s11 = int_to_ptr.vmem [resolvable:$true] %s54_s11  ;;  %s68_s13 = int_to_ptr.vmem [resolvable:$true] %s67_s13 }
  0x27   :  { %s2058_s18 = scalar_lea.hbm %s3556_s6, 512 }
  0x28   :  { %p2059_p2 = scmp.ne.s32.totalorder %s3556_s6, %s2058_s18  ;;  %p2062_p3 = scmp.lt.u32.totalorder %s2058_s18, %s3556_s6 }
  0x2a   :  { %p2064_p4 = pnand %p2062_p3, %p2059_p2 }
  0x2c   :  { %2067 = shalt.err (!%p2064_p4)
}
  0x2d   :  { %s2068_s1 = scalar_lea.vmem %s55_s11, 512  ;;  %p2073_p6 = scmp.lt.s32.totalorder %s55_s11, %s55_s11 }
  0x2e   :  { %p2069_p5 = scmp.ne.s32.totalorder %s55_s11, %s2068_s1  ;;  %p2074_p7 = scmp.lt.s32.totalorder %s2068_s1, %s2068_s1 }
  0x30   :  { %p2075_p8 = por %p2074_p7, %p2073_p6 }
  0x32   :  { %p2076_p9 = pnand %p2075_p8, %p2069_p5 }
  0x34   :  { %2079 = shalt.err (!%p2076_p9)
}
  0x35   :  { %60 = dma.hbm_to_vmem [thread:$0]  %s3556_s6, 512, %s55_s11, [#allocation6], %s2133_s15, %s2133_s15, %s2134_s16  }
  0x36   :  { %s2080_s27 = scalar_lea.hbm %s3557_s7, 512 }
  0x37   :  { %p2081_p10 = scmp.ne.s32.totalorder %s3557_s7, %s2080_s27  ;;  %p2084_p11 = scmp.lt.u32.totalorder %s2080_s27, %s3557_s7 }
  0x39   :  { %p2086_p12 = pnand %p2084_p11, %p2081_p10 }
  0x3b   :  { %2089 = shalt.err (!%p2086_p12)
}
  0x3c   :  { %s2090_s9 = scalar_lea.vmem %s68_s13, 512  ;;  %p2095_p0 = scmp.lt.s32.totalorder %s68_s13, %s68_s13 }
  0x3d   :  { %p2091_p13 = scmp.ne.s32.totalorder %s68_s13, %s2090_s9  ;;  %p2096_p1 = scmp.lt.s32.totalorder %s2090_s9, %s2090_s9 }
  0x3f   :  { %p2097_p2 = por %p2096_p1, %p2095_p0 }
  0x41   :  { %p2098_p3 = pnand %p2097_p2, %p2091_p13 }
  0x43   :  { %2101 = shalt.err (!%p2098_p3)
}
  0x44   :  { %70 = dma.hbm_to_vmem [thread:$0]  %s3557_s7, 512, %s68_s13, [#allocation9]  }
  0x45   :  { %2124 = dma.done.wait [#allocation3], 8192  }
  0x46   :  { %2125 = vsyncadd [#allocation3], 4294959104 }
  0x47   :  { %2126 = dma.done.wait [#allocation6], 1024  }
  0x48   :  { %2127 = vsyncadd [#allocation6], 4294966272 }
  0x49   :  { %2128 = dma.done.wait [#allocation9], 512  }
  0x4a   :  { %2129 = vsyncadd [#allocation9], 4294966784  ;;  %v2140_v0 = vmov 0.0   ;;  %v85_v1 = vld [vmem:[#allocation2 + $0x8] sm:$0xff]  ;;  %v84_v3 = vld [vmem:[#allocation2] sm:$0xff]  ;;  %vm1191_vm0 = vcmask 523264  }
  0x4b   :  { %234 = vmatprep.mubr.f32.mxu1 %v2140_v0  ;;  %v89_v2 = vld [vmem:[#allocation2 + $0x28] sm:$0xff]  ;;  %v88_v5 = vld [vmem:[#allocation2 + $0x20] sm:$0xff]  ;;  %v87_v58 = vld [vmem:[#allocation2 + $0x18] sm:$0xff]  ;;  %vm2142_vm1 = vmmov 0   ;;  %vm1270_vm2 = vcmask 261120  }
  0x4c   :  { %v1476_v4 = vpack.c.bf16 %v89_v2, %v85_v1  ;;  %v93_v6 = vld [vmem:[#allocation2 + $0x48] sm:$0xff]  ;;  %v1478_v8 = vpack.c.bf16 %v88_v5, %v84_v3  ;;  %v92_v10 = vld [vmem:[#allocation2 + $0x40] sm:$0xff]  ;;  %v91_v59 = vld [vmem:[#allocation2 + $0x38] sm:$0xff] }
  0x4d   :  { %v97_v7 = vld [vmem:[#allocation2 + $0x68] sm:$0xff]  ;;  %v96_v11 = vld [vmem:[#allocation2 + $0x60] sm:$0xff]  ;;  %v1508_v5 = vpack.c.bf16 %v91_v59, %v87_v58  ;;  %v122_v58 = vld [vmem:[#allocation2 + $0x130] sm:$0xff] }
  0x4e   :  { %v1480_v9 = vpack.c.bf16 %v97_v7, %v93_v6  ;;  %v101_v12 = vld [vmem:[#allocation2 + $0x88] sm:$0xff]  ;;  %1477 = vmatprep.subr.bf16.mxu1 %v1476_v4  ;;  %v1482_v14 = vpack.c.bf16 %v96_v11, %v92_v10  ;;  %v100_v16 = vld [vmem:[#allocation2 + $0x80] sm:$0xff]  ;;  %v86_v6 = vld [vmem:[#allocation2 + $0x10] sm:$0xff] }
  0x4f   :  { %v105_v13 = vld [vmem:[#allocation2 + $0xa8] sm:$0xff]  ;;  %1479 = vmatpush1.bf16.msra.mxu1 %v1478_v8  ;;  %v104_v17 = vld [vmem:[#allocation2 + $0xa0] sm:$0xff]  ;;  %v90_v7 = vld [vmem:[#allocation2 + $0x30] sm:$0xff] }
  0x50   :  { %1481 = vmatprep.subr.bf16.mxu1 %v1480_v9  ;;  %v1484_v15 = vpack.c.bf16 %v105_v13, %v101_v12  ;;  %v109_v18 = vld [vmem:[#allocation2 + $0xc8] sm:$0xff]  ;;  %v1486_v20 = vpack.c.bf16 %v104_v17, %v100_v16  ;;  %v108_v22 = vld [vmem:[#allocation2 + $0xc0] sm:$0xff]  ;;  %v95_v9 = vld [vmem:[#allocation2 + $0x58] sm:$0xff]  ;;  %v1510_v17 = vpack.c.bf16 %v90_v7, %v86_v6 }
  0x51   :  { %v113_v19 = vld [vmem:[#allocation2 + $0xe8] sm:$0xff]  ;;  %v112_v23 = vld [vmem:[#allocation2 + $0xe0] sm:$0xff]  ;;  %v99_v10 = vld [vmem:[#allocation2 + $0x78] sm:$0xff] }
  0x52   :  { %v1488_v21 = vpack.c.bf16 %v113_v19, %v109_v18  ;;  %v117_v24 = vld [vmem:[#allocation2 + $0x108] sm:$0xff]  ;;  %v1490_v26 = vpack.c.bf16 %v112_v23, %v108_v22  ;;  %v116_v28 = vld [vmem:[#allocation2 + $0x100] sm:$0xff]  ;;  %v98_v22 = vld [vmem:[#allocation2 + $0x70] sm:$0xff] }
  0x53   :  { %1483 = vmatpush1.bf16.msra.mxu1 %v1482_v14  ;;  %v121_v25 = vld [vmem:[#allocation2 + $0x128] sm:$0xff]  ;;  %v120_v29 = vld [vmem:[#allocation2 + $0x120] sm:$0xff]  ;;  %v103_v23 = vld [vmem:[#allocation2 + $0x98] sm:$0xff] }
  0x54   :  { %1485 = vmatprep.subr.bf16.mxu1 %v1484_v15  ;;  %v1492_v27 = vpack.c.bf16 %v121_v25, %v117_v24  ;;  %v125_v30 = vld [vmem:[#allocation2 + $0x148] sm:$0xff]  ;;  %v1494_v32 = vpack.c.bf16 %v120_v29, %v116_v28  ;;  %v124_v34 = vld [vmem:[#allocation2 + $0x140] sm:$0xff]  ;;  %v107_v24 = vld [vmem:[#allocation2 + $0xb8] sm:$0xff] }
  0x55   :  { %v129_v31 = vld [vmem:[#allocation2 + $0x168] sm:$0xff]  ;;  %v128_v35 = vld [vmem:[#allocation2 + $0x160] sm:$0xff]  ;;  %v127_v59 = vld [vmem:[#allocation2 + $0x158] sm:$0xff] }
  0x56   :  { %v1496_v33 = vpack.c.bf16 %v129_v31, %v125_v30  ;;  %v133_v36 = vld [vmem:[#allocation2 + $0x188] sm:$0xff]  ;;  %v1498_v38 = vpack.c.bf16 %v128_v35, %v124_v34  ;;  %v132_v40 = vld [vmem:[#allocation2 + $0x180] sm:$0xff]  ;;  %v106_v34 = vld [vmem:[#allocation2 + $0xb0] sm:$0xff] }
  0x57   :  { %1487 = vmatpush1.bf16.msra.mxu1 %v1486_v20  ;;  %v137_v37 = vld [vmem:[#allocation2 + $0x1a8] sm:$0xff]  ;;  %v136_v41 = vld [vmem:[#allocation2 + $0x1a0] sm:$0xff]  ;;  %v1512_v20 = vpack.c.bf16 %v99_v10, %v95_v9  ;;  %v111_v35 = vld [vmem:[#allocation2 + $0xd8] sm:$0xff] }
  0x58   :  { %1489 = vmatprep.subr.bf16.mxu1 %v1488_v21  ;;  %v1500_v39 = vpack.c.bf16 %v137_v37, %v133_v36  ;;  %v317_v42 = vld [vmem:[%s3552_s2 + $0x8] sm:$0xff]  ;;  %v316_v47 = vld [vmem:[%s3552_s2] sm:$0xff]  ;;  %v1502_v49 = vpack.c.bf16 %v136_v41, %v132_v40  ;;  %v94_v21 = vld [vmem:[#allocation2 + $0x50] sm:$0xff] }
  0x59   :  { %v141_v43 = vld [vmem:[#allocation2 + $0x1c8] sm:$0xff]  ;;  %v320_v48 = vld [vmem:[%s3552_s2 + $0x20] sm:$0xff]  ;;  %v1514_v29 = vpack.c.bf16 %v98_v22, %v94_v21  ;;  %v115_v36 = vld [vmem:[#allocation2 + $0xf8] sm:$0xff] }
  0x5a   :  { %v145_v44 = vld [vmem:[#allocation2 + $0x1e8] sm:$0xff]  ;;  %v1542_v50 = vpack.c.bf16 %v320_v48, %v316_v47  ;;  %v140_v54 = vld [vmem:[#allocation2 + $0x1c0] sm:$0xff]  ;;  %v119_v47 = vld [vmem:[#allocation2 + $0x118] sm:$0xff] }
  0x5b   :  { %1491 = vmatpush1.bf16.msra.mxu1 %v1490_v26  ;;  %v321_v45 = vld [vmem:[%s3552_s2 + $0x28] sm:$0xff]  ;;  %v1504_v53 = vpack.c.bf16 %v145_v44, %v141_v43  ;;  %v144_v55 = vld [vmem:[#allocation2 + $0x1e0] sm:$0xff]  ;;  %v1520_v44 = vpack.c.bf16 %v115_v36, %v111_v35  ;;  %v123_v48 = vld [vmem:[#allocation2 + $0x138] sm:$0xff] }
  0x5c   :  { %1493 = vmatprep.subr.bf16.mxu1 %v1492_v27  ;;  %v1540_v46 = vpack.c.bf16 %v321_v45, %v317_v42  ;;  %v325_v51 = vld [vmem:[%s3552_s2 + $0x48] sm:$0xff]  ;;  %v324_v57 = vld [vmem:[%s3552_s2 + $0x40] sm:$0xff]  ;;  %v1506_v1 = vpack.c.bf16 %v144_v55, %v140_v54  ;;  %v110_v45 = vld [vmem:[#allocation2 + $0xd0] sm:$0xff] }
  0x5d   :  { %v329_v52 = vld [vmem:[%s3552_s2 + $0x68] sm:$0xff]  ;;  %v328_v60 = vld [vmem:[%s3552_s2 + $0x60] sm:$0xff]  ;;  %v126_v6 = vld [vmem:[#allocation2 + $0x150] sm:$0xff] }
  0x5e   :  { %1541 = vmatprep.subr.bf16.mxu0 %v1540_v46  ;;  %v1544_v56 = vpack.c.bf16 %v329_v52, %v325_v51  ;;  %v1546_v61 = vpack.c.bf16 %v328_v60, %v324_v57  ;;  %v333_v62 = vld [vmem:[%s3552_s2 + $0x88] sm:$0xff]  ;;  %v332_v3 = vld [vmem:[%s3552_s2 + $0x80] sm:$0xff]  ;;  %v114_v46 = vld [vmem:[#allocation2 + $0xf0] sm:$0xff] }
  0x5f   :  { %1495 = vmatpush1.bf16.msra.mxu1 %v1494_v32  ;;  %1543 = vmatpush1.bf16.msra.mxu0 %v1542_v50  ;;  %v337_v63 = vld [vmem:[%s3552_s2 + $0xa8] sm:$0xff]  ;;  %v336_v4 = vld [vmem:[%s3552_s2 + $0xa0] sm:$0xff]  ;;  %v1516_v32 = vpack.c.bf16 %v107_v24, %v103_v23  ;;  %v118_v57 = vld [vmem:[#allocation2 + $0x110] sm:$0xff] }
  0x60   :  { %1497 = vmatprep.subr.bf16.mxu1 %v1496_v33  ;;  %1545 = vmatprep.subr.bf16.mxu0 %v1544_v56  ;;  %v1548_v2 = vpack.c.bf16 %v337_v63, %v333_v62  ;;  %v341_v8 = vld [vmem:[%s3552_s2 + $0xc8] sm:$0xff]  ;;  %v1550_v11 = vpack.c.bf16 %v336_v4, %v332_v3  ;;  %v340_v14 = vld [vmem:[%s3552_s2 + $0xc0] sm:$0xff]  ;;  %v102_v33 = vld [vmem:[#allocation2 + $0x90] sm:$0xff]  ;;  %v1524_v56 = vpack.c.bf16 %v123_v48, %v119_v47 }
  0x61   :  { %v345_v12 = vld [vmem:[%s3552_s2 + $0xe8] sm:$0xff]  ;;  %v344_v15 = vld [vmem:[%s3552_s2 + $0xe0] sm:$0xff]  ;;  %v1518_v41 = vpack.c.bf16 %v106_v34, %v102_v33  ;;  %v131_v60 = vld [vmem:[#allocation2 + $0x178] sm:$0xff] }
  0x62   :  { %v1552_v13 = vpack.c.bf16 %v345_v12, %v341_v8  ;;  %v2295_v16 = vld [vmem:[%s3550_s0] sm:$0x3]  ;;  %v349_v18 = vld [vmem:[%s3552_s2 + $0x108] sm:$0xff]  ;;  %v1554_v25 = vpack.c.bf16 %v344_v15, %v340_v14  ;;  %v130_v7 = vld [vmem:[#allocation2 + $0x170] sm:$0xff] }
  0x63   :  { %1499 = vmatpush1.bf16.msra.mxu1 %v1498_v38  ;;  %1547 = vmatpush1.bf16.msra.mxu0 %v1546_v61  ;;  %v353_v19 = vld [vmem:[%s3552_s2 + $0x128] sm:$0xff]  ;;  %v348_v27 = vld [vmem:[%s3552_s2 + $0x100] sm:$0xff]  ;;  %v135_v8 = vld [vmem:[#allocation2 + $0x198] sm:$0xff]  ;;  %v1530_v14 = vpack.c.bf16 %v130_v7, %v126_v6 }
  0x64   :  { %1501 = vmatprep.subr.bf16.mxu1 %v1500_v39  ;;  %1549 = vmatprep.subr.bf16.mxu0 %v1548_v2  ;;  %v1556_v26 = vpack.c.bf16 %v353_v19, %v349_v18  ;;  %v352_v28 = vld [vmem:[%s3552_s2 + $0x120] sm:$0xff]  ;;  %v357_v30 = vld [vmem:[%s3552_s2 + $0x148] sm:$0xff]  ;;  %v1526_v2 = vpack.c.bf16 %v122_v58, %v118_v57  ;;  %v139_v9 = vld [vmem:[#allocation2 + $0x1b8] sm:$0xff] }
  0x65   :  { %v361_v31 = vld [vmem:[%s3552_s2 + $0x168] sm:$0xff]  ;;  %v1558_v37 = vpack.c.bf16 %v352_v28, %v348_v27  ;;  %v356_v39 = vld [vmem:[%s3552_s2 + $0x140] sm:$0xff]  ;;  %v1532_v18 = vpack.c.bf16 %v139_v9, %v135_v8  ;;  %v134_v19 = vld [vmem:[#allocation2 + $0x190] sm:$0xff] }
  0x66   :  { %v1560_v38 = vpack.c.bf16 %v361_v31, %v357_v30  ;;  %v360_v40 = vld [vmem:[%s3552_s2 + $0x160] sm:$0xff]  ;;  %v365_v42 = vld [vmem:[%s3552_s2 + $0x188] sm:$0xff]  ;;  %v143_v21 = vld [vmem:[#allocation2 + $0x1d8] sm:$0xff] }
  0x67   :  { %1503 = vmatpush1.bf16.msra.mxu1 %v1502_v49  ;;  %1551 = vmatpush1.bf16.msra.mxu0 %v1550_v11  ;;  %v369_v43 = vld [vmem:[%s3552_s2 + $0x1a8] sm:$0xff]  ;;  %v1562_v49 = vpack.c.bf16 %v360_v40, %v356_v39  ;;  %v364_v51 = vld [vmem:[%s3552_s2 + $0x180] sm:$0xff]  ;;  %v147_v22 = vld [vmem:[#allocation2 + $0x1f8] sm:$0xff] }
  0x68   :  { %1505 = vmatprep.subr.bf16.mxu1 %v1504_v53  ;;  %1553 = vmatprep.subr.bf16.mxu0 %v1552_v13  ;;  %v1564_v50 = vpack.c.bf16 %v369_v43, %v365_v42  ;;  %v368_v52 = vld [vmem:[%s3552_s2 + $0x1a0] sm:$0xff]  ;;  %v1522_v53 = vpack.c.bf16 %v114_v46, %v110_v45  ;;  %v373_v54 = vld [vmem:[%s3552_s2 + $0x1c8] sm:$0xff]  ;;  %v1536_v30 = vpack.c.bf16 %v147_v22, %v143_v21  ;;  %v142_v31 = vld [vmem:[#allocation2 + $0x1d0] sm:$0xff] }
  0x69   :  { %v377_v55 = vld [vmem:[%s3552_s2 + $0x1e8] sm:$0xff]  ;;  %v1566_v61 = vpack.c.bf16 %v368_v52, %v364_v51  ;;  %v372_v63 = vld [vmem:[%s3552_s2 + $0x1c0] sm:$0xff]  ;;  %v319_v33 = vld [vmem:[%s3552_s2 + $0x18] sm:$0xff] }
  0x6a   :  { %v1568_v62 = vpack.c.bf16 %v377_v55, %v373_v54  ;;  %v381_v3 = vld [vmem:[%s3552_s2 + $0x208] sm:$0xff]  ;;  %v380_v12 = vld [vmem:[%s3552_s2 + $0x200] sm:$0xff]  ;;  %v323_v34 = vld [vmem:[%s3552_s2 + $0x38] sm:$0xff] }
  0x6b   :  { %1507 = vmatpush1.bf16.msra.mxu1 %v1506_v1  ;;  %1555 = vmatpush1.bf16.msra.mxu0 %v1554_v25  ;;  %v376_v1 = vld [vmem:[%s3552_s2 + $0x1e0] sm:$0xff]  ;;  %v385_v4 = vld [vmem:[%s3552_s2 + $0x228] sm:$0xff]  ;;  %v1668_v42 = vpack.c.bf16 %v323_v34, %v319_v33  ;;  %v318_v43 = vld [vmem:[%s3552_s2 + $0x10] sm:$0xff] }
  0x6c   :  { %1509 = vmatprep.subr.bf16.mxu1 %v1508_v5  ;;  %1557 = vmatprep.subr.bf16.mxu0 %v1556_v26  ;;  %v1528_v5 = vpack.c.bf16 %v131_v60, %v127_v59  ;;  %v1570_v10 = vpack.c.bf16 %v376_v1, %v372_v63  ;;  %v1572_v11 = vpack.c.bf16 %v385_v4, %v381_v3  ;;  %v384_v13 = vld [vmem:[%s3552_s2 + $0x220] sm:$0xff]  ;;  %v389_v15 = vld [vmem:[%s3552_s2 + $0x248] sm:$0xff]  ;;  %v327_v45 = vld [vmem:[%s3552_s2 + $0x58] sm:$0xff] }
  0x6d   :  { %v1574_v23 = vpack.c.bf16 %v384_v13, %v380_v12  ;;  %v388_v25 = vld [vmem:[%s3552_s2 + $0x240] sm:$0xff]  ;;  %v397_v28 = vld [vmem:[%s3552_s2 + $0x288] sm:$0xff]  ;;  %v331_v46 = vld [vmem:[%s3552_s2 + $0x78] sm:$0xff] }
  0x6e   :  { %235 = vmatmul.mubr.f32.vlgmr.msra.gmra.mrb[0].mxu1 %v2295_v16  ;;  %v392_v26 = vld [vmem:[%s3552_s2 + $0x260] sm:$0xff]  ;;  %v405_v40 = vld [vmem:[%s3552_s2 + $0x2c8] sm:$0xff]  ;;  %v1672_v54 = vpack.c.bf16 %v331_v46, %v327_v45  ;;  %v326_v55 = vld [vmem:[%s3552_s2 + $0x50] sm:$0xff] }
  0x6f   :  { %1511 = vmatpush1.bf16.msra.mxu1 %v1510_v17  ;;  %305 = vmatprep.mubr.f32.mxu1 %v2140_v0  ;;  %v393_v17 = vld [vmem:[%s3552_s2 + $0x268] sm:$0xff]  ;;  %v1578_v35 = vpack.c.bf16 %v392_v26, %v388_v25  ;;  %v335_v57 = vld [vmem:[%s3552_s2 + $0x98] sm:$0xff]  ;;  %v334_v63 = vld [vmem:[%s3552_s2 + $0x90] sm:$0xff] }
  0x70   :  { %1513 = vmatprep.subr.bf16.mxu1 %v1512_v20  ;;  %1559 = vmatpush1.bf16.msra.mxu0 %v1558_v37  ;;  %v138_v20 = vld [vmem:[#allocation2 + $0x1b0] sm:$0xff]  ;;  %v1576_v24 = vpack.c.bf16 %v393_v17, %v389_v15  ;;  %v396_v37 = vld [vmem:[%s3552_s2 + $0x280] sm:$0xff]  ;;  %v413_v52 = vld [vmem:[%s3552_s2 + $0x308] sm:$0xff] }
  0x71   :  { %1561 = vmatprep.subr.bf16.mxu0 %v1560_v38  ;;  %v1534_v27 = vpack.c.bf16 %v138_v20, %v134_v19  ;;  %v400_v38 = vld [vmem:[%s3552_s2 + $0x2a0] sm:$0xff]  ;;  %v339_v58 = vld [vmem:[%s3552_s2 + $0xb8] sm:$0xff]  ;;  %v338_v1 = vld [vmem:[%s3552_s2 + $0xb0] sm:$0xff] }
  0x72   :  { %v1582_v47 = vpack.c.bf16 %v400_v38, %v396_v37  ;;  %v1678_v3 = vpack.c.bf16 %v338_v1, %v334_v63  ;;  %v346_v6 = vld [vmem:[%s3552_s2 + $0xf0] sm:$0xff]  ;;  %v351_v7 = vld [vmem:[%s3552_s2 + $0x118] sm:$0xff] }
  0x73   :  { %1515 = vmatpush1.bf16.msra.mxu1 %v1514_v29  ;;  %v401_v29 = vld [vmem:[%s3552_s2 + $0x2a8] sm:$0xff]  ;;  %v355_v8 = vld [vmem:[%s3552_s2 + $0x138] sm:$0xff]  ;;  %v354_v12 = vld [vmem:[%s3552_s2 + $0x130] sm:$0xff] }
  0x74   :  { %1517 = vmatprep.subr.bf16.mxu1 %v1516_v32  ;;  %1563 = vmatpush1.bf16.msra.mxu0 %v1562_v49  ;;  %v146_v32 = vld [vmem:[#allocation2 + $0x1f0] sm:$0xff]  ;;  %v1580_v36 = vpack.c.bf16 %v401_v29, %v397_v28  ;;  %v404_v49 = vld [vmem:[%s3552_s2 + $0x2c0] sm:$0xff]  ;;  %v359_v13 = vld [vmem:[%s3552_s2 + $0x158] sm:$0xff] }
  0x75   :  { %1565 = vmatprep.subr.bf16.mxu0 %v1564_v50  ;;  %v1538_v39 = vpack.c.bf16 %v146_v32, %v142_v31  ;;  %v408_v50 = vld [vmem:[%s3552_s2 + $0x2e0] sm:$0xff]  ;;  %v362_v19 = vld [vmem:[%s3552_s2 + $0x170] sm:$0xff]  ;;  %v367_v20 = vld [vmem:[%s3552_s2 + $0x198] sm:$0xff] }
  0x76   :  { %v1586_v59 = vpack.c.bf16 %v408_v50, %v404_v49  ;;  %v371_v21 = vld [vmem:[%s3552_s2 + $0x1b8] sm:$0xff]  ;;  %v370_v25 = vld [vmem:[%s3552_s2 + $0x1b0] sm:$0xff] }
  0x77   :  { %1519 = vmatpush1.bf16.msra.mxu1 %v1518_v41  ;;  %v409_v41 = vld [vmem:[%s3552_s2 + $0x2e8] sm:$0xff]  ;;  %v375_v26 = vld [vmem:[%s3552_s2 + $0x1d8] sm:$0xff]  ;;  %v378_v31 = vld [vmem:[%s3552_s2 + $0x1f0] sm:$0xff] }
  0x78   :  { %1521 = vmatprep.subr.bf16.mxu1 %v1520_v44  ;;  %1567 = vmatpush1.bf16.msra.mxu0 %v1566_v61  ;;  %v322_v44 = vld [vmem:[%s3552_s2 + $0x30] sm:$0xff]  ;;  %v1584_v48 = vpack.c.bf16 %v409_v41, %v405_v40  ;;  %v383_v32 = vld [vmem:[%s3552_s2 + $0x218] sm:$0xff] }
  0x79   :  { %1569 = vmatprep.subr.bf16.mxu0 %v1568_v62  ;;  %v1670_v51 = vpack.c.bf16 %v322_v44, %v318_v43  ;;  %v1676_v62 = vpack.c.bf16 %v339_v58, %v335_v57  ;;  %v387_v33 = vld [vmem:[%s3552_s2 + $0x238] sm:$0xff]  ;;  %v386_v37 = vld [vmem:[%s3552_s2 + $0x230] sm:$0xff] }
  0x7a   :  { %v391_v38 = vld [vmem:[%s3552_s2 + $0x258] sm:$0xff]  ;;  %v394_v43 = vld [vmem:[%s3552_s2 + $0x270] sm:$0xff] }
  0x7b   :  { %1523 = vmatpush1.bf16.msra.mxu1 %v1522_v53  ;;  %v417_v53 = vld [vmem:[%s3552_s2 + $0x328] sm:$0xff]  ;;  %v399_v44 = vld [vmem:[%s3552_s2 + $0x298] sm:$0xff]  ;;  %v402_v49 = vld [vmem:[%s3552_s2 + $0x2b0] sm:$0xff] }
  0x7c   :  { %1525 = vmatprep.subr.bf16.mxu1 %v1524_v56  ;;  %1571 = vmatpush1.bf16.msra.mxu0 %v1570_v10  ;;  %v330_v56 = vld [vmem:[%s3552_s2 + $0x70] sm:$0xff]  ;;  %v1588_v60 = vpack.c.bf16 %v417_v53, %v413_v52  ;;  %v1684_v10 = vpack.c.bf16 %v355_v8, %v351_v7  ;;  %v403_v45 = vld [vmem:[%s3552_s2 + $0x2b8] sm:$0xff]  ;;  %v420_v7 = vld [vmem:[%s3552_s2 + $0x340] sm:$0xff] }
  0x7d   :  { %1573 = vmatprep.subr.bf16.mxu0 %v1572_v11  ;;  %v1674_v61 = vpack.c.bf16 %v330_v56, %v326_v55  ;;  %v350_v11 = vld [vmem:[%s3552_s2 + $0x110] sm:$0xff]  ;;  %v407_v50 = vld [vmem:[%s3552_s2 + $0x2d8] sm:$0xff]  ;;  %v424_v8 = vld [vmem:[%s3552_s2 + $0x360] sm:$0xff] }
  0x7e   :  { %v1686_v15 = vpack.c.bf16 %v354_v12, %v350_v11  ;;  %v410_v55 = vld [vmem:[%s3552_s2 + $0x2f0] sm:$0xff]  ;;  %v415_v56 = vld [vmem:[%s3552_s2 + $0x318] sm:$0xff] }
  0x7f   :  { %1527 = vmatpush1.bf16.msra.mxu1 %v1526_v2  ;;  %v343_v2 = vld [vmem:[%s3552_s2 + $0xd8] sm:$0xff]  ;;  %v418_v1 = vld [vmem:[%s3552_s2 + $0x330] sm:$0xff] }
  0x80   :  { %1529 = vmatprep.subr.bf16.mxu1 %v1528_v5  ;;  %1575 = vmatpush1.bf16.msra.mxu0 %v1574_v23  ;;  %v342_v5 = vld [vmem:[%s3552_s2 + $0xd0] sm:$0xff]  ;;  %v1692_v23 = vpack.c.bf16 %v371_v21, %v367_v20  ;;  %v419_v57 = vld [vmem:[%s3552_s2 + $0x338] sm:$0xff]  ;;  %v428_v20 = vld [vmem:[%s3552_s2 + $0x380] sm:$0xff] }
  0x81   :  { %1577 = vmatprep.subr.bf16.mxu0 %v1576_v24  ;;  %v1682_v9 = vpack.c.bf16 %v346_v6, %v342_v5  ;;  %v366_v24 = vld [vmem:[%s3552_s2 + $0x190] sm:$0xff]  ;;  %v427_v6 = vld [vmem:[%s3552_s2 + $0x378] sm:$0xff]  ;;  %v432_v21 = vld [vmem:[%s3552_s2 + $0x3a0] sm:$0xff] }
  0x82   :  { %v1694_v28 = vpack.c.bf16 %v370_v25, %v366_v24  ;;  %v422_v11 = vld [vmem:[%s3552_s2 + $0x350] sm:$0xff] }
  0x83   :  { %1531 = vmatpush1.bf16.msra.mxu1 %v1530_v14  ;;  %v363_v14 = vld [vmem:[%s3552_s2 + $0x178] sm:$0xff]  ;;  %v426_v12 = vld [vmem:[%s3552_s2 + $0x370] sm:$0xff] }
  0x84   :  { %1533 = vmatprep.subr.bf16.mxu1 %v1532_v18  ;;  %1579 = vmatpush1.bf16.msra.mxu0 %v1578_v35  ;;  %v1688_v17 = vpack.c.bf16 %v363_v14, %v359_v13  ;;  %v358_v18 = vld [vmem:[%s3552_s2 + $0x150] sm:$0xff]  ;;  %v1700_v35 = vpack.c.bf16 %v387_v33, %v383_v32  ;;  %v1722_v13 = vpack.c.bf16 %v426_v12, %v422_v11  ;;  %v429_v14 = vld [vmem:[%s3552_s2 + $0x388] sm:$0xff]  ;;  %v436_v33 = vld [vmem:[%s3552_s2 + $0x3c0] sm:$0xff] }
  0x85   :  { %1581 = vmatprep.subr.bf16.mxu0 %v1580_v36  ;;  %v1690_v22 = vpack.c.bf16 %v362_v19, %v358_v18  ;;  %v382_v36 = vld [vmem:[%s3552_s2 + $0x210] sm:$0xff]  ;;  %v435_v19 = vld [vmem:[%s3552_s2 + $0x3b8] sm:$0xff]  ;;  %v465_v11 = vld [vmem:[%s3552_s2 + $0x4a8] sm:$0xff] }
  0x86   :  { %v1702_v40 = vpack.c.bf16 %v386_v37, %v382_v36  ;;  %v430_v24 = vld [vmem:[%s3552_s2 + $0x390] sm:$0xff]  ;;  %v463_v12 = vld [vmem:[%s3552_s2 + $0x498] sm:$0xff] }
  0x87   :  { %1535 = vmatpush1.bf16.msra.mxu1 %v1534_v27  ;;  %v379_v27 = vld [vmem:[%s3552_s2 + $0x1f8] sm:$0xff]  ;;  %v434_v25 = vld [vmem:[%s3552_s2 + $0x3b0] sm:$0xff] }
  0x88   :  { %1537 = vmatprep.subr.bf16.mxu1 %v1536_v30  ;;  %1583 = vmatpush1.bf16.msra.mxu0 %v1582_v47  ;;  %v1696_v29 = vpack.c.bf16 %v379_v27, %v375_v26  ;;  %v374_v30 = vld [vmem:[%s3552_s2 + $0x1d0] sm:$0xff]  ;;  %v1708_v47 = vpack.c.bf16 %v403_v45, %v399_v44  ;;  %v437_v26 = vld [vmem:[%s3552_s2 + $0x3c8] sm:$0xff]  ;;  %v1726_v27 = vpack.c.bf16 %v434_v25, %v430_v24  ;;  %v150_v45 = vlaneseq  ;;  %v471_v25 = vld [vmem:[%s3552_s2 + $0x4d8] sm:$0xff] }
  0x89   :  { %1585 = vmatprep.subr.bf16.mxu0 %v1584_v48  ;;  %v1698_v34 = vpack.c.bf16 %v378_v31, %v374_v30  ;;  %v398_v48 = vld [vmem:[%s3552_s2 + $0x290] sm:$0xff]  ;;  %v443_v30 = vld [vmem:[%s3552_s2 + $0x3f8] sm:$0xff]  ;;  %v473_v24 = vld [vmem:[%s3552_s2 + $0x4e8] sm:$0xff] }
  0x8a   :  { %v1710_v52 = vpack.c.bf16 %v402_v49, %v398_v48  ;;  %v442_v37 = vld [vmem:[%s3552_s2 + $0x3f0] sm:$0xff] }
  0x8b   :  { %1539 = vmatpush1.bf16.msra.mxu1 %v1538_v39  ;;  %v395_v39 = vld [vmem:[%s3552_s2 + $0x278] sm:$0xff] }
  0x8c   :  { %1669 = vmatprep.subr.bf16.mxu1 %v1668_v42  ;;  %1587 = vmatpush1.bf16.msra.mxu0 %v1586_v59  ;;  %v1704_v41 = vpack.c.bf16 %v395_v39, %v391_v38  ;;  %v390_v42 = vld [vmem:[%s3552_s2 + $0x250] sm:$0xff]  ;;  %v1716_v59 = vpack.c.bf16 %v419_v57, %v415_v56  ;;  %v445_v39 = vld [vmem:[%s3552_s2 + $0x408] sm:$0xff]  ;;  %v444_v56 = vld [vmem:[%s3552_s2 + $0x400] sm:$0xff] }
  0x8d   :  { %1589 = vmatprep.subr.bf16.mxu0 %v1588_v60  ;;  %v1706_v46 = vpack.c.bf16 %v394_v43, %v390_v42  ;;  %v412_v60 = vld [vmem:[%s3552_s2 + $0x300] sm:$0xff]  ;;  %v451_v43 = vld [vmem:[%s3552_s2 + $0x438] sm:$0xff] }
  0x8e   :  { %306 = vmatmul.mubr.f32.vlgmr.msra.gmra.mrb[2].mxu1 %v2295_v16  ;;  %v347_v16 = vld [vmem:[%s3552_s2 + $0xf8] sm:$0xff]  ;;  %v448_v57 = vld [vmem:[%s3552_s2 + $0x420] sm:$0xff] }
  0x8f   :  { %1671 = vmatpush1.bf16.msra.mxu1 %v1670_v51  ;;  %v1680_v4 = vpack.c.bf16 %v347_v16, %v343_v2  ;;  %v411_v51 = vld [vmem:[%s3552_s2 + $0x2f8] sm:$0xff]  ;;  %v421_v16 = vld [vmem:[%s3552_s2 + $0x348] sm:$0xff] }
  0x90   :  { %1673 = vmatprep.subr.bf16.mxu1 %v1672_v54  ;;  %v1712_v53 = vpack.c.bf16 %v411_v51, %v407_v50  ;;  %v406_v54 = vld [vmem:[%s3552_s2 + $0x2d0] sm:$0xff] }
  0x91   :  { %v1714_v58 = vpack.c.bf16 %v410_v55, %v406_v54  ;;  %v2653_v48 = vld [vmem:[#allocation8] ss:$8 sm:$0xf] }
  0x93   :  { %1675 = vmatpush1.bf16.msra.mxu1 %v1674_v61  ;;  %v416_v61 = vld [vmem:[%s3552_s2 + $0x320] sm:$0xff] }
  0x94   :  { %1677 = vmatprep.subr.bf16.mxu1 %v1676_v62  ;;  %v414_v62 = vld [vmem:[%s3552_s2 + $0x310] sm:$0xff]  ;;  %v1590_v63 = vpack.c.bf16 %v416_v61, %v412_v60  ;;  %v453_v60 = vld [vmem:[%s3552_s2 + $0x448] sm:$0xff] }
  0x95   :  { %v1718_v2 = vpack.c.bf16 %v418_v1, %v414_v62  ;;  %v457_v61 = vld [vmem:[%s3552_s2 + $0x468] sm:$0xff]  ;;  %v455_v62 = vld [vmem:[%s3552_s2 + $0x458] sm:$0xff]  ;;  %v1606_v1 = vpack.c.bf16 %v448_v57, %v444_v56 }
  0x96   :  { %1591 = vmatpush1.bf16.msra.mxu0 %v1590_v63  ;;  %v459_v63 = vld [vmem:[%s3552_s2 + $0x478] sm:$0xff] }
  0x97   :  { %1679 = vmatpush1.bf16.msra.mxu1 %v1678_v3  ;;  %v425_v3 = vld [vmem:[%s3552_s2 + $0x368] sm:$0xff] }
  0x98   :  { %1681 = vmatprep.subr.bf16.mxu1 %v1680_v4  ;;  %v423_v4 = vld [vmem:[%s3552_s2 + $0x358] sm:$0xff]  ;;  %v1592_v5 = vpack.c.bf16 %v425_v3, %v421_v16  ;;  %v452_v16 = vld [vmem:[%s3552_s2 + $0x440] sm:$0xff] }
  0x99   :  { %v456_v3 = vld [vmem:[%s3552_s2 + $0x460] sm:$0xff] }
  0x9a   :  { %1593 = vmatprep.subr.bf16.mxu0 %v1592_v5  ;;  %v1608_v5 = vpack.c.bf16 %v457_v61, %v453_v60 }
  0x9b   :  { %1683 = vmatpush1.bf16.msra.mxu1 %v1682_v9  ;;  %v1720_v9 = vpack.c.bf16 %v427_v6, %v423_v4  ;;  %v1736_v6 = vpack.c.bf16 %v459_v63, %v455_v62  ;;  %v486_v62 = vld [vmem:[%s3552_s2 + $0x550] sm:$0xff] }
  0x9c   :  { %1685 = vmatprep.subr.bf16.mxu1 %v1684_v10  ;;  %v1594_v10 = vpack.c.bf16 %v424_v8, %v420_v7  ;;  %v454_v7 = vld [vmem:[%s3552_s2 + $0x450] sm:$0xff] }
  0x9d   :  { %v458_v8 = vld [vmem:[%s3552_s2 + $0x470] sm:$0xff] }
  0x9e   :  { %1595 = vmatpush1.bf16.msra.mxu0 %v1594_v10  ;;  %v490_v63 = vld [vmem:[%s3552_s2 + $0x570] sm:$0xff] }
  0x9f   :  { %1687 = vmatpush1.bf16.msra.mxu1 %v1686_v15  ;;  %v433_v15 = vld [vmem:[%s3552_s2 + $0x3a8] sm:$0xff] }
  0xa0   :  { %1689 = vmatprep.subr.bf16.mxu1 %v1688_v17  ;;  %v431_v17 = vld [vmem:[%s3552_s2 + $0x398] sm:$0xff]  ;;  %v1596_v18 = vpack.c.bf16 %v433_v15, %v429_v14  ;;  %v1610_v14 = vpack.c.bf16 %v456_v3, %v452_v16  ;;  %v1738_v15 = vpack.c.bf16 %v458_v8, %v454_v7  ;;  %v497_v16 = vld [vmem:[%s3552_s2 + $0x5a8] sm:$0xff]  ;;  %v1754_v7 = vpack.c.bf16 %v490_v63, %v486_v62  ;;  %v492_v8 = vld [vmem:[%s3552_s2 + $0x580] sm:$0xff] }
  0xa1   :  { %v495_v3 = vld [vmem:[%s3552_s2 + $0x598] sm:$0xff] }
  0xa2   :  { %1597 = vmatprep.subr.bf16.mxu0 %v1596_v18  ;;  %v464_v18 = vld [vmem:[%s3552_s2 + $0x4a0] sm:$0xff]  ;;  %v531_v62 = vld [vmem:[%s3552_s2 + $0x6b8] sm:$0xff] }
  0xa3   :  { %1691 = vmatpush1.bf16.msra.mxu1 %v1690_v22  ;;  %v1724_v22 = vpack.c.bf16 %v435_v19, %v431_v17  ;;  %v460_v17 = vld [vmem:[%s3552_s2 + $0x480] sm:$0xff] }
  0xa4   :  { %1693 = vmatprep.subr.bf16.mxu1 %v1692_v23  ;;  %v1598_v23 = vpack.c.bf16 %v432_v21, %v428_v20  ;;  %v462_v21 = vld [vmem:[%s3552_s2 + $0x490] sm:$0xff] }
  0xa6   :  { %1599 = vmatpush1.bf16.msra.mxu0 %v1598_v23  ;;  %v469_v23 = vld [vmem:[%s3552_s2 + $0x4c8] sm:$0xff] }
  0xa7   :  { %1695 = vmatpush1.bf16.msra.mxu1 %v1694_v28  ;;  %v441_v28 = vld [vmem:[%s3552_s2 + $0x3e8] sm:$0xff] }
  0xa8   :  { %1697 = vmatprep.subr.bf16.mxu1 %v1696_v29  ;;  %v439_v29 = vld [vmem:[%s3552_s2 + $0x3d8] sm:$0xff]  ;;  %v1600_v31 = vpack.c.bf16 %v441_v28, %v437_v26 }
  0xa9   :  { %v1728_v32 = vpack.c.bf16 %v443_v30, %v439_v29  ;;  %v475_v26 = vld [vmem:[%s3552_s2 + $0x4f8] sm:$0xff]  ;;  %v468_v29 = vld [vmem:[%s3552_s2 + $0x4c0] sm:$0xff] }
  0xaa   :  { %1601 = vmatprep.subr.bf16.mxu0 %v1600_v31  ;;  %v472_v30 = vld [vmem:[%s3552_s2 + $0x4e0] sm:$0xff]  ;;  %v1616_v31 = vpack.c.bf16 %v473_v24, %v469_v23 }
  0xab   :  { %1699 = vmatpush1.bf16.msra.mxu1 %v1698_v34  ;;  %v440_v34 = vld [vmem:[%s3552_s2 + $0x3e0] sm:$0xff] }
  0xac   :  { %1701 = vmatprep.subr.bf16.mxu1 %v1700_v35  ;;  %v438_v35 = vld [vmem:[%s3552_s2 + $0x3d0] sm:$0xff]  ;;  %v1602_v36 = vpack.c.bf16 %v440_v34, %v436_v33  ;;  %v500_v23 = vld [vmem:[%s3552_s2 + $0x5c0] sm:$0xff] }
  0xad   :  { %v1730_v38 = vpack.c.bf16 %v442_v37, %v438_v35  ;;  %v470_v33 = vld [vmem:[%s3552_s2 + $0x4d0] sm:$0xff]  ;;  %v477_v35 = vld [vmem:[%s3552_s2 + $0x508] sm:$0xff]  ;;  %v479_v37 = vld [vmem:[%s3552_s2 + $0x518] sm:$0xff] }
  0xae   :  { %1603 = vmatpush1.bf16.msra.mxu0 %v1602_v36  ;;  %v474_v34 = vld [vmem:[%s3552_s2 + $0x4f0] sm:$0xff]  ;;  %v481_v36 = vld [vmem:[%s3552_s2 + $0x528] sm:$0xff]  ;;  %v504_v24 = vld [vmem:[%s3552_s2 + $0x5e0] sm:$0xff] }
  0xaf   :  { %1703 = vmatpush1.bf16.msra.mxu1 %v1702_v40  ;;  %v449_v40 = vld [vmem:[%s3552_s2 + $0x428] sm:$0xff] }
  0xb0   :  { %1705 = vmatprep.subr.bf16.mxu1 %v1704_v41  ;;  %v447_v41 = vld [vmem:[%s3552_s2 + $0x418] sm:$0xff]  ;;  %v1604_v42 = vpack.c.bf16 %v449_v40, %v445_v39  ;;  %v1618_v39 = vpack.c.bf16 %v472_v30, %v468_v29  ;;  %v1746_v40 = vpack.c.bf16 %v474_v34, %v470_v33  ;;  %v509_v29 = vld [vmem:[%s3552_s2 + $0x608] sm:$0xff]  ;;  %v1634_v33 = vpack.c.bf16 %v504_v24, %v500_v23 }
  0xb1   :  { %v1732_v44 = vpack.c.bf16 %v451_v43, %v447_v41  ;;  %v476_v41 = vld [vmem:[%s3552_s2 + $0x500] sm:$0xff]  ;;  %v1620_v43 = vpack.c.bf16 %v481_v36, %v477_v35  ;;  %v513_v30 = vld [vmem:[%s3552_s2 + $0x628] sm:$0xff]  ;;  %v543_v23 = vld [vmem:[%s3552_s2 + $0x718] sm:$0xff] }
  0xb2   :  { %1605 = vmatprep.subr.bf16.mxu0 %v1604_v42  ;;  %v480_v42 = vld [vmem:[%s3552_s2 + $0x520] sm:$0xff]  ;;  %v547_v24 = vld [vmem:[%s3552_s2 + $0x738] sm:$0xff] }
  0xb3   :  { %1707 = vmatpush1.bf16.msra.mxu1 %v1706_v46  ;;  %v2648_v46 = vshrl.u32 %v150_v45, 7  ;;  %v478_v45 = vld [vmem:[%s3552_s2 + $0x510] sm:$0xff]  ;;  %v1622_v56 = vpack.c.bf16 %v480_v42, %v476_v41  ;;  %v508_v35 = vld [vmem:[%s3552_s2 + $0x600] sm:$0xff]  ;;  %v517_v41 = vld [vmem:[%s3552_s2 + $0x648] sm:$0xff] }
  0xb4   :  { %1709 = vmatprep.subr.bf16.mxu1 %v1708_v47  ;;  %v512_v36 = vld [vmem:[%s3552_s2 + $0x620] sm:$0xff]  ;;  %v521_v42 = vld [vmem:[%s3552_s2 + $0x668] sm:$0xff] }
  0xb5   :  { %v2651_v47 = vsub.s32 0, %v2648_v46  ;;  %v2656_v49 = vsub.s32 1, %v2648_v46 }
  0xb7   :  { %1711 = vmatpush1.bf16.msra.mxu1 %v1710_v52  ;;  %v153_v50 = vrot.slane %v2653_v48, %v2651_v47  ;;  %v157_v51 = vrot.slane %v2653_v48, %v2656_v49 }
  0xb8   :  { %1713 = vmatprep.subr.bf16.mxu1 %v1712_v53 }
  0xbb   :  { %1715 = vmatpush1.bf16.msra.mxu1 %v1714_v58  ;;  %v446_v58 = vld [vmem:[%s3552_s2 + $0x410] sm:$0xff] }
  0xbc   :  { %1717 = vmatprep.subr.bf16.mxu1 %v1716_v59  ;;  %v450_v59 = vld [vmem:[%s3552_s2 + $0x430] sm:$0xff] }
  0xbf   :  { %1719 = vmatpush1.bf16.msra.mxu1 %v1718_v2  ;;  %v1734_v2 = vpack.c.bf16 %v450_v59, %v446_v58  ;;  %v484_v58 = vld [vmem:[%s3552_s2 + $0x540] sm:$0xff] }
  0xc0   :  { %1721 = vmatprep.subr.bf16.mxu1 %v1720_v9  ;;  %v461_v9 = vld [vmem:[%s3552_s2 + $0x488] sm:$0xff]  ;;  %v488_v59 = vld [vmem:[%s3552_s2 + $0x560] sm:$0xff] }
  0xc1   :  { %v1612_v19 = vpack.c.bf16 %v465_v11, %v461_v9  ;;  %v496_v9 = vld [vmem:[%s3552_s2 + $0x5a0] sm:$0xff] }
  0xc3   :  { %1723 = vmatpush1.bf16.msra.mxu1 %v1722_v13  ;;  %v467_v13 = vld [vmem:[%s3552_s2 + $0x4b8] sm:$0xff] }
  0xc4   :  { %1725 = vmatprep.subr.bf16.mxu1 %v1724_v22  ;;  %v1740_v20 = vpack.c.bf16 %v467_v13, %v463_v12  ;;  %v466_v22 = vld [vmem:[%s3552_s2 + $0x4b0] sm:$0xff] }
  0xc5   :  { %v1742_v28 = vpack.c.bf16 %v466_v22, %v462_v21  ;;  %v494_v13 = vld [vmem:[%s3552_s2 + $0x590] sm:$0xff]  ;;  %v1630_v21 = vpack.c.bf16 %v496_v9, %v492_v8  ;;  %v533_v8 = vld [vmem:[%s3552_s2 + $0x6c8] sm:$0xff] }
  0xc6   :  { %v537_v9 = vld [vmem:[%s3552_s2 + $0x6e8] sm:$0xff] }
  0xc7   :  { %1727 = vmatpush1.bf16.msra.mxu1 %v1726_v27  ;;  %v1614_v27 = vpack.c.bf16 %v464_v18, %v460_v17  ;;  %v505_v18 = vld [vmem:[%s3552_s2 + $0x5e8] sm:$0xff] }
  0xc8   :  { %1729 = vmatprep.subr.bf16.mxu1 %v1728_v32  ;;  %v1744_v32 = vpack.c.bf16 %v475_v26, %v471_v25 }
  0xcb   :  { %1731 = vmatpush1.bf16.msra.mxu1 %v1730_v38  ;;  %v483_v38 = vld [vmem:[%s3552_s2 + $0x538] sm:$0xff] }
  0xcc   :  { %1733 = vmatprep.subr.bf16.mxu1 %v1732_v44  ;;  %v1748_v44 = vpack.c.bf16 %v483_v38, %v479_v37  ;;  %v1636_v37 = vpack.c.bf16 %v513_v30, %v509_v29  ;;  %v544_v29 = vld [vmem:[%s3552_s2 + $0x720] sm:$0xff] }
 0x141   :  { %v236_v52 = vpop.f32.mrb[0].mxu1 }
 0x142   :  { %v237_v53 = vadd.f32 %v236_v52, %v153_v50  ;;  %v238_v54 = vpop.f32.mrb[1].mxu1  ;;  %v482_v50 = vld [vmem:[%s3552_s2 + $0x530] sm:$0xff]  ;;  %v164_v52 = vsub.s32 3, %v2648_v46 }
 0x143   :  { %v239_v55 = vadd.f32 %v238_v54, %v157_v51  ;;  %v485_v51 = vld [vmem:[%s3552_s2 + $0x548] sm:$0xff]  ;;  %v487_v54 = vld [vmem:[%s3552_s2 + $0x558] sm:$0xff]  ;;  %v1750_v57 = vpack.c.bf16 %v482_v50, %v478_v45  ;;  %v1638_v45 = vpack.c.bf16 %v512_v36, %v508_v35 }
 0x144   :  { %v553_v35 = vld [vmem:[%s3552_s2 + $0x768] sm:$0xff]  ;;  %v551_v36 = vld [vmem:[%s3552_s2 + $0x758] sm:$0xff] }
 0x145   :  { %1996 = vtanh.f32 %v239_v55  ;;  %v491_v55 = vld [vmem:[%s3552_s2 + $0x578] sm:$0xff] }
 0x146   :  { %1998 = vtanh.f32 %v237_v53  ;;  %v489_v53 = vld [vmem:[%s3552_s2 + $0x568] sm:$0xff]  ;;  %v1752_v61 = vpack.c.bf16 %v491_v55, %v487_v54  ;;  %v1640_v55 = vpack.c.bf16 %v521_v42, %v517_v41  ;;  %v548_v41 = vld [vmem:[%s3552_s2 + $0x740] sm:$0xff] }
 0x147   :  { %v1624_v60 = vpack.c.bf16 %v489_v53, %v485_v51  ;;  %v516_v51 = vld [vmem:[%s3552_s2 + $0x640] sm:$0xff] }
 0x148   :  { %v520_v53 = vld [vmem:[%s3552_s2 + $0x660] sm:$0xff] }
 0x149   :  { %v1642_v63 = vpack.c.bf16 %v520_v53, %v516_v51  ;;  %v552_v42 = vld [vmem:[%s3552_s2 + $0x760] sm:$0xff]  ;;  %v561_v51 = vld [vmem:[%s3552_s2 + $0x7a8] sm:$0xff]  ;;  %v559_v53 = vld [vmem:[%s3552_s2 + $0x798] sm:$0xff] }
 0x14f   :  { %v1997_v4 = vpop.eup %1996 }
 0x150   :  { %v1999_v10 = vpop.eup %1998  ;;  %659 = vmatprep.mubr.f32.mxu0 %v1997_v4  ;;  %801 = vmatprep.mubr.f32.mxu1 %v1997_v4  ;;  %v499_v4 = vld [vmem:[%s3552_s2 + $0x5b8] sm:$0xff] }
 0x151   :  { %660 = vmatmul.mubr.f32.vlgmr.msra.gmra.mrb[0].mxu0 %v1999_v10  ;;  %802 = vmatmul.mubr.f32.vlgmr.msra.gmra.mrb[4].mxu1 %v1999_v10  ;;  %v1756_v12 = vpack.c.bf16 %v499_v4, %v495_v3 }
 0x152   :  { %1607 = vmatpush1.bf16.msra.mxu0 %v1606_v1  ;;  %1735 = vmatpush1.bf16.msra.mxu1 %v1734_v2  ;;  %v493_v1 = vld [vmem:[%s3552_s2 + $0x588] sm:$0xff]  ;;  %v165_v2 = vrot.slane %v2653_v48, %v164_v52 }
 0x153   :  { %1609 = vmatprep.subr.bf16.mxu0 %v1608_v5  ;;  %1737 = vmatprep.subr.bf16.mxu1 %v1736_v6  ;;  %v1626_v6 = vpack.c.bf16 %v488_v59, %v484_v58  ;;  %v1628_v11 = vpack.c.bf16 %v497_v16, %v493_v1  ;;  %v522_v58 = vld [vmem:[%s3552_s2 + $0x670] sm:$0xff]  ;;  %v525_v59 = vld [vmem:[%s3552_s2 + $0x688] sm:$0xff]  ;;  %v528_v16 = vld [vmem:[%s3552_s2 + $0x6a0] sm:$0xff] }
 0x156   :  { %1611 = vmatpush1.bf16.msra.mxu0 %v1610_v14  ;;  %1739 = vmatpush1.bf16.msra.mxu1 %v1738_v15  ;;  %v498_v14 = vld [vmem:[%s3552_s2 + $0x5b0] sm:$0xff]  ;;  %v501_v15 = vld [vmem:[%s3552_s2 + $0x5c8] sm:$0xff] }
 0x157   :  { %1613 = vmatprep.subr.bf16.mxu0 %v1612_v19  ;;  %1741 = vmatprep.subr.bf16.mxu1 %v1740_v20  ;;  %v503_v19 = vld [vmem:[%s3552_s2 + $0x5d8] sm:$0xff]  ;;  %v1758_v22 = vpack.c.bf16 %v498_v14, %v494_v13  ;;  %v1632_v25 = vpack.c.bf16 %v505_v18, %v501_v15  ;;  %v532_v14 = vld [vmem:[%s3552_s2 + $0x6c0] sm:$0xff] }
 0x158   :  { %v507_v20 = vld [vmem:[%s3552_s2 + $0x5f8] sm:$0xff]  ;;  %v536_v15 = vld [vmem:[%s3552_s2 + $0x6e0] sm:$0xff] }
 0x159   :  { %v1760_v26 = vpack.c.bf16 %v507_v20, %v503_v19  ;;  %v534_v19 = vld [vmem:[%s3552_s2 + $0x6d0] sm:$0xff] }
 0x15a   :  { %1615 = vmatpush1.bf16.msra.mxu0 %v1614_v27  ;;  %1743 = vmatpush1.bf16.msra.mxu1 %v1742_v28  ;;  %v502_v27 = vld [vmem:[%s3552_s2 + $0x5d0] sm:$0xff] }
 0x15b   :  { %1617 = vmatprep.subr.bf16.mxu0 %v1616_v31  ;;  %1745 = vmatprep.subr.bf16.mxu1 %v1744_v32  ;;  %v506_v28 = vld [vmem:[%s3552_s2 + $0x5f0] sm:$0xff]  ;;  %v511_v31 = vld [vmem:[%s3552_s2 + $0x618] sm:$0xff] }
 0x15c   :  { %v515_v32 = vld [vmem:[%s3552_s2 + $0x638] sm:$0xff]  ;;  %v1762_v34 = vpack.c.bf16 %v506_v28, %v502_v27  ;;  %v538_v20 = vld [vmem:[%s3552_s2 + $0x6f0] sm:$0xff]  ;;  %v160_v27 = vsub.s32 2, %v2648_v46  ;;  %v540_v28 = vld [vmem:[%s3552_s2 + $0x700] sm:$0xff] }
 0x15d   :  { %v1764_v38 = vpack.c.bf16 %v515_v32, %v511_v31  ;;  %v1780_v31 = vpack.c.bf16 %v547_v24, %v543_v23  ;;  %v542_v32 = vld [vmem:[%s3552_s2 + $0x710] sm:$0xff]  ;;  %v887_v24 = vld [vmem:[%s3553_s3 + $0x20] sm:$0xff]  ;;  %v1006_v46 = vld [vmem:[%s3553_s3 + $0x3d8] sm:$0xff] }
 0x15e   :  { %1619 = vmatpush1.bf16.msra.mxu0 %v1618_v39  ;;  %1747 = vmatpush1.bf16.msra.mxu1 %v1746_v40  ;;  %v510_v39 = vld [vmem:[%s3552_s2 + $0x610] sm:$0xff] }
 0x15f   :  { %1621 = vmatprep.subr.bf16.mxu0 %v1620_v43  ;;  %1749 = vmatprep.subr.bf16.mxu1 %v1748_v44  ;;  %v514_v40 = vld [vmem:[%s3552_s2 + $0x630] sm:$0xff]  ;;  %v519_v43 = vld [vmem:[%s3552_s2 + $0x658] sm:$0xff] }
 0x160   :  { %v523_v44 = vld [vmem:[%s3552_s2 + $0x678] sm:$0xff]  ;;  %v1766_v50 = vpack.c.bf16 %v514_v40, %v510_v39  ;;  %v1654_v39 = vpack.c.bf16 %v544_v29, %v540_v28  ;;  %v892_v28 = vld [vmem:[%s3553_s3 + $0x48] sm:$0xff] }
 0x161   :  { %v2810_v5 = vpop.f32.mrb[2].mxu1  ;;  %v894_v29 = vld [vmem:[%s3553_s3 + $0x58] sm:$0xff] }
 0x162   :  { %1623 = vmatpush1.bf16.msra.mxu0 %v1622_v56  ;;  %1751 = vmatpush1.bf16.msra.mxu1 %v1750_v57  ;;  %v309_v10 = vpop.f32.mrb[3].mxu1  ;;  %v1768_v56 = vpack.c.bf16 %v523_v44, %v519_v43  ;;  %v518_v57 = vld [vmem:[%s3552_s2 + $0x650] sm:$0xff] }
 0x163   :  { %1625 = vmatprep.subr.bf16.mxu0 %v1624_v60  ;;  %1753 = vmatprep.subr.bf16.mxu1 %v1752_v61  ;;  %v310_v17 = vadd.f32 %v309_v10, %v165_v2  ;;  %v529_v60 = vld [vmem:[%s3552_s2 + $0x6a8] sm:$0xff]  ;;  %v527_v61 = vld [vmem:[%s3552_s2 + $0x698] sm:$0xff]  ;;  %v1770_v1 = vpack.c.bf16 %v522_v58, %v518_v57  ;;  %v524_v2 = vld [vmem:[%s3552_s2 + $0x680] sm:$0xff] }
 0x164   :  { %v1644_v3 = vpack.c.bf16 %v529_v60, %v525_v59  ;;  %v1772_v4 = vpack.c.bf16 %v531_v62, %v527_v61  ;;  %v535_v10 = vld [vmem:[%s3552_s2 + $0x6d8] sm:$0xff]  ;;  %v556_v58 = vld [vmem:[%s3552_s2 + $0x780] sm:$0xff]  ;;  %v562_v62 = vld [vmem:[%s3552_s2 + $0x7b0] sm:$0xff] }
 0x165   :  { %2000 = vtanh.f32 %v310_v17  ;;  %v1648_v17 = vpack.c.bf16 %v537_v9, %v533_v8  ;;  %v560_v59 = vld [vmem:[%s3552_s2 + $0x7a0] sm:$0xff] }
 0x166   :  { %1627 = vmatpush1.bf16.msra.mxu0 %v1626_v6  ;;  %1755 = vmatpush1.bf16.msra.mxu1 %v1754_v7  ;;  %v526_v6 = vld [vmem:[%s3552_s2 + $0x690] sm:$0xff]  ;;  %v568_v9 = vld [vmem:[%s3552_s2 + $0x7e0] sm:$0xff] }
 0x167   :  { %1629 = vmatprep.subr.bf16.mxu0 %v1628_v11  ;;  %1757 = vmatprep.subr.bf16.mxu1 %v1756_v12  ;;  %v530_v7 = vld [vmem:[%s3552_s2 + $0x6b0] sm:$0xff]  ;;  %v539_v11 = vld [vmem:[%s3552_s2 + $0x6f8] sm:$0xff]  ;;  %v1646_v12 = vpack.c.bf16 %v528_v16, %v524_v2 }
 0x168   :  { %v1774_v13 = vpack.c.bf16 %v530_v7, %v526_v6  ;;  %v1776_v18 = vpack.c.bf16 %v539_v11, %v535_v10  ;;  %v567_v2 = vld [vmem:[%s3552_s2 + $0x7d8] sm:$0xff]  ;;  %v564_v6 = vld [vmem:[%s3552_s2 + $0x7c0] sm:$0xff]  ;;  %v566_v10 = vld [vmem:[%s3552_s2 + $0x7d0] sm:$0xff] }
 0x169   :  { %v571_v16 = vld [vmem:[%s3552_s2 + $0x7f8] sm:$0xff]  ;;  %v570_v11 = vld [vmem:[%s3552_s2 + $0x7f0] sm:$0xff] }
 0x16a   :  { %1631 = vmatpush1.bf16.msra.mxu0 %v1630_v21  ;;  %1759 = vmatpush1.bf16.msra.mxu1 %v1758_v22  ;;  %v541_v21 = vld [vmem:[%s3552_s2 + $0x708] sm:$0xff]  ;;  %v1792_v8 = vpack.c.bf16 %v571_v16, %v567_v2  ;;  %v911_v2 = vld [vmem:[%s3553_s3 + $0xe0] sm:$0xff]  ;;  %v913_v16 = vld [vmem:[%s3553_s3 + $0xf0] sm:$0xff] }
 0x16b   :  { %1633 = vmatprep.subr.bf16.mxu0 %v1632_v25  ;;  %1761 = vmatprep.subr.bf16.mxu1 %v1760_v26  ;;  %v545_v22 = vld [vmem:[%s3552_s2 + $0x728] sm:$0xff]  ;;  %v1650_v25 = vpack.c.bf16 %v536_v15, %v532_v14  ;;  %v1778_v26 = vpack.c.bf16 %v538_v20, %v534_v19  ;;  %v1666_v14 = vpack.c.bf16 %v568_v9, %v564_v6  ;;  %v885_v19 = vld [vmem:[%s3553_s3 + $0x10] sm:$0xff] }
 0x16c   :  { %v1652_v30 = vpack.c.bf16 %v545_v22, %v541_v21  ;;  %v1794_v15 = vpack.c.bf16 %v570_v11, %v566_v10  ;;  %v888_v20 = vld [vmem:[%s3553_s3 + $0x28] sm:$0xff]  ;;  %v890_v21 = vld [vmem:[%s3553_s3 + $0x38] sm:$0xff]  ;;  %v1826_v6 = vpack.c.bf16 %v913_v16, %v911_v2  ;;  %v917_v9 = vld [vmem:[%s3553_s3 + $0x110] sm:$0xff] }
 0x16d   :  { %v1800_v23 = vpack.c.bf16 %v890_v21, %v888_v20  ;;  %v920_v10 = vld [vmem:[%s3553_s3 + $0x128] sm:$0xff]  ;;  %v922_v11 = vld [vmem:[%s3553_s3 + $0x138] sm:$0xff]  ;;  %v923_v21 = vld [vmem:[%s3553_s3 + $0x140] sm:$0xff] }
 0x16e   :  { %1635 = vmatpush1.bf16.msra.mxu0 %v1634_v33  ;;  %1763 = vmatpush1.bf16.msra.mxu1 %v1762_v34  ;;  %v546_v33 = vld [vmem:[%s3552_s2 + $0x730] sm:$0xff]  ;;  %v549_v34 = vld [vmem:[%s3552_s2 + $0x748] sm:$0xff]  ;;  %v1169_v16 = vld [vmem:[%s3554_s4 + $0x18] sm:$0xff] }
 0x16f   :  { %v2001_v54 = vpop.eup %2000  ;;  %1637 = vmatprep.subr.bf16.mxu0 %v1636_v37  ;;  %1765 = vmatprep.subr.bf16.mxu1 %v1764_v38  ;;  %v555_v37 = vld [vmem:[%s3552_s2 + $0x778] sm:$0xff]  ;;  %v161_v38 = vrot.slane %v2653_v48, %v160_v27  ;;  %v1782_v40 = vpack.c.bf16 %v546_v33, %v542_v32  ;;  %v1656_v43 = vpack.c.bf16 %v553_v35, %v549_v34  ;;  %v554_v48 = vld [vmem:[%s3552_s2 + $0x770] sm:$0xff]  ;;  %v891_v32 = vld [vmem:[%s3553_s3 + $0x40] sm:$0xff] }
 0x170   :  { %730 = vmatprep.mubr.f32.mxu0 %v2001_v54  ;;  %872 = vmatprep.mubr.f32.mxu1 %v2001_v54  ;;  %v1784_v44 = vpack.c.bf16 %v555_v37, %v551_v36  ;;  %v563_v54 = vld [vmem:[%s3552_s2 + $0x7b8] sm:$0xff]  ;;  %v893_v33 = vld [vmem:[%s3553_s3 + $0x50] sm:$0xff]  ;;  %v896_v34 = vld [vmem:[%s3553_s3 + $0x68] sm:$0xff] }
 0x171   :  { %v1788_v61 = vpack.c.bf16 %v563_v54, %v559_v53  ;;  %v898_v35 = vld [vmem:[%s3553_s3 + $0x78] sm:$0xff]  ;;  %v1806_v36 = vpack.c.bf16 %v893_v33, %v891_v32  ;;  %v903_v54 = vld [vmem:[%s3553_s3 + $0xa0] sm:$0xff] }
 0x172   :  { %1639 = vmatpush1.bf16.msra.mxu0 %v1638_v45  ;;  %1767 = vmatpush1.bf16.msra.mxu1 %v1766_v50  ;;  %v550_v45 = vld [vmem:[%s3552_s2 + $0x750] sm:$0xff]  ;;  %v557_v50 = vld [vmem:[%s3552_s2 + $0x788] sm:$0xff]  ;;  %v1808_v37 = vpack.c.bf16 %v898_v35, %v896_v34  ;;  %v931_v34 = vld [vmem:[%s3553_s3 + $0x180] sm:$0xff] }
 0x173   :  { %1641 = vmatprep.subr.bf16.mxu0 %v1640_v55  ;;  %1769 = vmatprep.subr.bf16.mxu1 %v1768_v56  ;;  %v308_v55 = vadd.f32 %v2810_v5, %v161_v38  ;;  %v1658_v56 = vpack.c.bf16 %v552_v42, %v548_v41  ;;  %v1786_v57 = vpack.c.bf16 %v554_v48, %v550_v45  ;;  %v558_v5 = vld [vmem:[%s3552_s2 + $0x790] sm:$0xff]  ;;  %v895_v38 = vld [vmem:[%s3553_s3 + $0x60] sm:$0xff]  ;;  %v902_v41 = vld [vmem:[%s3553_s3 + $0x98] sm:$0xff] }
 0x174   :  { %v1660_v60 = vpack.c.bf16 %v561_v51, %v557_v50  ;;  %v901_v45 = vld [vmem:[%s3553_s3 + $0x90] sm:$0xff]  ;;  %v904_v48 = vld [vmem:[%s3553_s3 + $0xa8] sm:$0xff]  ;;  %v906_v50 = vld [vmem:[%s3553_s3 + $0xb8] sm:$0xff] }
 0x175   :  { %2002 = vtanh.f32 %v308_v55  ;;  %v1816_v53 = vpack.c.bf16 %v906_v50, %v904_v48  ;;  %v905_v55 = vld [vmem:[%s3553_s3 + $0xb0] sm:$0xff] }
 0x176   :  { %1643 = vmatpush1.bf16.msra.mxu0 %v1642_v63  ;;  %1771 = vmatpush1.bf16.msra.mxu1 %v1770_v1  ;;  %v565_v63 = vld [vmem:[%s3552_s2 + $0x7c8] sm:$0xff]  ;;  %v933_v35 = vld [vmem:[%s3553_s3 + $0x190] sm:$0xff] }
 0x177   :  { %1645 = vmatprep.subr.bf16.mxu0 %v1644_v3  ;;  %1773 = vmatprep.subr.bf16.mxu1 %v1772_v4  ;;  %v569_v1 = vld [vmem:[%s3552_s2 + $0x7e8] sm:$0xff]  ;;  %v1662_v3 = vpack.c.bf16 %v560_v59, %v556_v58  ;;  %v1790_v4 = vpack.c.bf16 %v562_v62, %v558_v5  ;;  %v1818_v58 = vpack.c.bf16 %v905_v55, %v903_v54  ;;  %v914_v62 = vld [vmem:[%s3553_s3 + $0xf8] sm:$0xff]  ;;  %v941_v50 = vld [vmem:[%s3553_s3 + $0x1d0] sm:$0xff] }
 0x178   :  { %v1664_v7 = vpack.c.bf16 %v569_v1, %v565_v63  ;;  %v912_v5 = vld [vmem:[%s3553_s3 + $0xe8] sm:$0xff] }
 0x179   :  { %v1824_v1 = vpack.c.bf16 %v914_v62, %v912_v5  ;;  %v1166_v5 = vld [vmem:[%s3554_s4] sm:$0xff]  ;;  %v1167_v62 = vld [vmem:[%s3554_s4 + $0x8] sm:$0xff] }
 0x17a   :  { %1647 = vmatpush1.bf16.msra.mxu0 %v1646_v12  ;;  %1775 = vmatpush1.bf16.msra.mxu1 %v1774_v13  ;;  %v884_v12 = vld [vmem:[%s3553_s3 + $0x8] sm:$0xff]  ;;  %v886_v13 = vld [vmem:[%s3553_s3 + $0x18] sm:$0xff]  ;;  %v1925_v2 = vpack.c.bf16 %v1167_v62, %v1166_v5  ;;  %v955_v62 = vld [vmem:[%s3553_s3 + $0x240] sm:$0xff] }
 0x17b   :  { %1649 = vmatprep.subr.bf16.mxu0 %v1648_v17  ;;  %1777 = vmatprep.subr.bf16.mxu1 %v1776_v18  ;;  %v1796_v17 = vpack.c.bf16 %v886_v13, %v884_v12  ;;  %v883_v18 = vld [vmem:[%s3553_s3] sm:$0xff]  ;;  %v1832_v13 = vpack.c.bf16 %v922_v11, %v920_v10 }
 0x17c   :  { %v1798_v22 = vpack.c.bf16 %v885_v19, %v883_v18  ;;  %v926_v18 = vld [vmem:[%s3553_s3 + $0x158] sm:$0xff]  ;;  %v1174_v11 = vld [vmem:[%s3554_s4 + $0x40] sm:$0xff] }
 0x17e   :  { %1651 = vmatpush1.bf16.msra.mxu0 %v1650_v25  ;;  %1779 = vmatpush1.bf16.msra.mxu1 %v1778_v26  ;;  %v889_v25 = vld [vmem:[%s3553_s3 + $0x30] sm:$0xff] }
 0x17f   :  { %1653 = vmatprep.subr.bf16.mxu0 %v1652_v30  ;;  %1781 = vmatprep.subr.bf16.mxu1 %v1780_v31  ;;  %v2003_v26 = vpop.eup %2002  ;;  %v1802_v30 = vpack.c.bf16 %v889_v25, %v887_v24  ;;  %v1804_v31 = vpack.c.bf16 %v894_v29, %v892_v28  ;;  %v930_v24 = vld [vmem:[%s3553_s3 + $0x178] sm:$0xff]  ;;  %v927_v28 = vld [vmem:[%s3553_s3 + $0x160] sm:$0xff]  ;;  %v929_v29 = vld [vmem:[%s3553_s3 + $0x170] sm:$0xff] }
 0x180   :  { %v1842_v32 = vpack.c.bf16 %v929_v29, %v927_v28  ;;  %v1184_v28 = vld [vmem:[%s3554_s4 + $0x90] sm:$0xff]  ;;  %v1185_v29 = vld [vmem:[%s3554_s4 + $0x98] sm:$0xff] }
 0x182   :  { %1655 = vmatpush1.bf16.msra.mxu0 %v1654_v39  ;;  %1783 = vmatpush1.bf16.msra.mxu1 %v1782_v40  ;;  %v897_v39 = vld [vmem:[%s3553_s3 + $0x70] sm:$0xff]  ;;  %v900_v40 = vld [vmem:[%s3553_s3 + $0x88] sm:$0xff] }
 0x183   :  { %1657 = vmatprep.subr.bf16.mxu0 %v1656_v43  ;;  %1785 = vmatprep.subr.bf16.mxu1 %v1784_v44  ;;  %v1810_v42 = vpack.c.bf16 %v897_v39, %v895_v38  ;;  %v1812_v43 = vpack.c.bf16 %v902_v41, %v900_v40  ;;  %v899_v44 = vld [vmem:[%s3553_s3 + $0x80] sm:$0xff]  ;;  %v938_v38 = vld [vmem:[%s3553_s3 + $0x1b8] sm:$0xff]  ;;  %v937_v41 = vld [vmem:[%s3553_s3 + $0x1b0] sm:$0xff] }
 0x184   :  { %v1814_v51 = vpack.c.bf16 %v901_v45, %v899_v44  ;;  %v935_v40 = vld [vmem:[%s3553_s3 + $0x1a0] sm:$0xff]  ;;  %v942_v44 = vld [vmem:[%s3553_s3 + $0x1d8] sm:$0xff] }
 0x185   :  { %v939_v45 = vld [vmem:[%s3553_s3 + $0x1c0] sm:$0xff] }
 0x186   :  { %1659 = vmatpush1.bf16.msra.mxu0 %v1658_v56  ;;  %1787 = vmatpush1.bf16.msra.mxu1 %v1786_v57  ;;  %v908_v56 = vld [vmem:[%s3553_s3 + $0xc8] sm:$0xff]  ;;  %v910_v57 = vld [vmem:[%s3553_s3 + $0xd8] sm:$0xff]  ;;  %v1854_v54 = vpack.c.bf16 %v941_v50, %v939_v45  ;;  %v947_v45 = vld [vmem:[%s3553_s3 + $0x200] sm:$0xff] }
 0x187   :  { %1661 = vmatprep.subr.bf16.mxu0 %v1660_v60  ;;  %1789 = vmatprep.subr.bf16.mxu1 %v1788_v61  ;;  %v1820_v59 = vpack.c.bf16 %v910_v57, %v908_v56  ;;  %v907_v60 = vld [vmem:[%s3553_s3 + $0xc0] sm:$0xff]  ;;  %v909_v61 = vld [vmem:[%s3553_s3 + $0xd0] sm:$0xff]  ;;  %v954_v50 = vld [vmem:[%s3553_s3 + $0x238] sm:$0xff] }
 0x188   :  { %v1822_v63 = vpack.c.bf16 %v909_v61, %v907_v60  ;;  %v943_v56 = vld [vmem:[%s3553_s3 + $0x1e0] sm:$0xff]  ;;  %v945_v57 = vld [vmem:[%s3553_s3 + $0x1f0] sm:$0xff]  ;;  %v950_v60 = vld [vmem:[%s3553_s3 + $0x218] sm:$0xff] }
 0x18a   :  { %1663 = vmatpush1.bf16.msra.mxu0 %v1662_v3  ;;  %1791 = vmatpush1.bf16.msra.mxu1 %v1790_v4  ;;  %v916_v3 = vld [vmem:[%s3553_s3 + $0x108] sm:$0xff]  ;;  %v918_v4 = vld [vmem:[%s3553_s3 + $0x118] sm:$0xff] }
 0x18b   :  { %1665 = vmatprep.subr.bf16.mxu0 %v1664_v7  ;;  %1793 = vmatprep.subr.bf16.mxu1 %v1792_v8  ;;  %v1828_v7 = vpack.c.bf16 %v918_v4, %v916_v3  ;;  %v915_v8 = vld [vmem:[%s3553_s3 + $0x100] sm:$0xff] }
 0x18c   :  { %v1830_v12 = vpack.c.bf16 %v917_v9, %v915_v8  ;;  %v1170_v4 = vld [vmem:[%s3554_s4 + $0x20] sm:$0xff]  ;;  %v1172_v8 = vld [vmem:[%s3554_s4 + $0x30] sm:$0xff]  ;;  %v1173_v9 = vld [vmem:[%s3554_s4 + $0x38] sm:$0xff] }
 0x18d   :  { %v1934_v10 = vpack.c.bf16 %v1173_v9, %v1172_v8  ;;  %v964_v8 = vld [vmem:[%s3553_s3 + $0x288] sm:$0xff]  ;;  %v966_v9 = vld [vmem:[%s3553_s3 + $0x298] sm:$0xff] }
 0x18e   :  { %1667 = vmatpush1.bf16.msra.mxu0 %v1666_v14  ;;  %1795 = vmatpush1.bf16.msra.mxu1 %v1794_v15  ;;  %v919_v14 = vld [vmem:[%s3553_s3 + $0x120] sm:$0xff]  ;;  %v921_v15 = vld [vmem:[%s3553_s3 + $0x130] sm:$0xff] }
 0x18f   :  { %1797 = vmatprep.subr.bf16.mxu0 %v1796_v17  ;;  %v924_v17 = vld [vmem:[%s3553_s3 + $0x148] sm:$0xff]  ;;  %v1834_v19 = vpack.c.bf16 %v921_v15, %v919_v14  ;;  %v1176_v14 = vld [vmem:[%s3554_s4 + $0x50] sm:$0xff]  ;;  %v1177_v15 = vld [vmem:[%s3554_s4 + $0x58] sm:$0xff] }
 0x190   :  { %v1836_v20 = vpack.c.bf16 %v926_v18, %v924_v17  ;;  %v1940_v17 = vpack.c.bf16 %v1177_v15, %v1176_v14  ;;  %v1178_v18 = vld [vmem:[%s3554_s4 + $0x60] sm:$0xff]  ;;  %v968_v14 = vld [vmem:[%s3553_s3 + $0x2a8] sm:$0xff]  ;;  %v970_v15 = vld [vmem:[%s3553_s3 + $0x2b8] sm:$0xff] }
 0x191   :  { %731 = vmatmul.mubr.f32.vlgmr.msra.gmra.mrb[0].mxu0 %v2003_v26  ;;  %873 = vmatmul.mubr.f32.vlgmr.msra.gmra.mrb[4].mxu1 %v2003_v26 }
 0x192   :  { %1799 = vmatpush1.bf16.msra.mxu0 %v1798_v22  ;;  %v925_v22 = vld [vmem:[%s3553_s3 + $0x150] sm:$0xff] }
 0x193   :  { %1801 = vmatprep.subr.bf16.mxu0 %v1800_v23  ;;  %v928_v23 = vld [vmem:[%s3553_s3 + $0x168] sm:$0xff]  ;;  %v1838_v25 = vpack.c.bf16 %v925_v22, %v923_v21  ;;  %v1180_v21 = vld [vmem:[%s3554_s4 + $0x70] sm:$0xff]  ;;  %v1181_v22 = vld [vmem:[%s3554_s4 + $0x78] sm:$0xff] }
 0x194   :  { %v1840_v26 = vpack.c.bf16 %v930_v24, %v928_v23  ;;  %v1946_v23 = vpack.c.bf16 %v1181_v22, %v1180_v21  ;;  %v1182_v24 = vld [vmem:[%s3554_s4 + $0x80] sm:$0xff]  ;;  %v972_v21 = vld [vmem:[%s3553_s3 + $0x2c8] sm:$0xff]  ;;  %v974_v22 = vld [vmem:[%s3553_s3 + $0x2d8] sm:$0xff] }
 0x196   :  { %1803 = vmatpush1.bf16.msra.mxu0 %v1802_v30  ;;  %v932_v30 = vld [vmem:[%s3553_s3 + $0x188] sm:$0xff] }
 0x197   :  { %1805 = vmatprep.subr.bf16.mxu0 %v1804_v31  ;;  %v934_v31 = vld [vmem:[%s3553_s3 + $0x198] sm:$0xff] }
 0x198   :  { %v1844_v33 = vpack.c.bf16 %v934_v31, %v932_v30  ;;  %v1952_v30 = vpack.c.bf16 %v1185_v29, %v1184_v28  ;;  %v1186_v31 = vld [vmem:[%s3554_s4 + $0xa0] sm:$0xff]  ;;  %v976_v28 = vld [vmem:[%s3553_s3 + $0x2e8] sm:$0xff]  ;;  %v978_v29 = vld [vmem:[%s3553_s3 + $0x2f8] sm:$0xff] }
 0x19a   :  { %1807 = vmatpush1.bf16.msra.mxu0 %v1806_v36  ;;  %v1846_v36 = vpack.c.bf16 %v933_v35, %v931_v34  ;;  %v3320_v34 = vld [vmem:[#allocation8 + $0x1] ss:$8 sm:$0xf] }
 0x19b   :  { %1809 = vmatprep.subr.bf16.mxu0 %v1808_v37  ;;  %v936_v37 = vld [vmem:[%s3553_s3 + $0x1a8] sm:$0xff]  ;;  %v578_v35 = vrot.slane %v3320_v34, %v2651_v47 }
 0x19c   :  { %v1848_v39 = vpack.c.bf16 %v938_v38, %v936_v37  ;;  %v590_v37 = vrot.slane %v3320_v34, %v164_v52  ;;  %v952_v52 = vld [vmem:[%s3553_s3 + $0x228] sm:$0xff] }
 0x19e   :  { %1811 = vmatpush1.bf16.msra.mxu0 %v1810_v42  ;;  %v1850_v42 = vpack.c.bf16 %v937_v41, %v935_v40 }
 0x19f   :  { %1813 = vmatprep.subr.bf16.mxu0 %v1812_v43  ;;  %v940_v43 = vld [vmem:[%s3553_s3 + $0x1c8] sm:$0xff] }
 0x1a0   :  { %v1852_v48 = vpack.c.bf16 %v942_v44, %v940_v43 }
 0x1a2   :  { %1815 = vmatpush1.bf16.msra.mxu0 %v1814_v51  ;;  %v944_v51 = vld [vmem:[%s3553_s3 + $0x1e8] sm:$0xff] }
 0x1a3   :  { %1817 = vmatprep.subr.bf16.mxu0 %v1816_v53  ;;  %v946_v53 = vld [vmem:[%s3553_s3 + $0x1f8] sm:$0xff] }
 0x1a4   :  { %v1856_v55 = vpack.c.bf16 %v946_v53, %v944_v51 }
 0x1a6   :  { %1819 = vmatpush1.bf16.msra.mxu0 %v1818_v58  ;;  %v1858_v58 = vpack.c.bf16 %v945_v57, %v943_v56  ;;  %v953_v56 = vld [vmem:[%s3553_s3 + $0x230] sm:$0xff] }
 0x1a7   :  { %1821 = vmatprep.subr.bf16.mxu0 %v1820_v59  ;;  %v948_v59 = vld [vmem:[%s3553_s3 + $0x208] sm:$0xff] }
 0x1a8   :  { %v1860_v61 = vpack.c.bf16 %v950_v60, %v948_v59  ;;  %v958_v59 = vld [vmem:[%s3553_s3 + $0x258] sm:$0xff] }
 0x1aa   :  { %1823 = vmatpush1.bf16.msra.mxu0 %v1822_v63  ;;  %v1168_v63 = vld [vmem:[%s3554_s4 + $0x10] sm:$0xff] }
 0x1ab   :  { %1825 = vmatprep.subr.bf16.mxu0 %v1824_v1  ;;  %v2141_v1 = vmov 0.0|0.0   ;;  %v1928_v3 = vpack.c.bf16 %v1169_v16, %v1168_v63  ;;  %v957_v63 = vld [vmem:[%s3553_s3 + $0x250] sm:$0xff]  ;;  %v962_v16 = vld [vmem:[%s3553_s3 + $0x278] sm:$0xff] }
 0x1ac   :  { %1924 = vmatprep.subr.bf16.mxu1 %v2141_v1 }
 0x1ad   :  { %1926 = vmatpush1.bf16.msra.mxu1 %v1925_v2  ;;  %v960_v2 = vld [vmem:[%s3553_s3 + $0x268] sm:$0xff] }
 0x1ae   :  { %1827 = vmatpush1.bf16.msra.mxu0 %v1826_v6  ;;  %1927 = vmatprep.subr.bf16.mxu1 %v2141_v1  ;;  %v1171_v6 = vld [vmem:[%s3554_s4 + $0x28] sm:$0xff] }
 0x1af   :  { %1829 = vmatprep.subr.bf16.mxu0 %v1828_v7  ;;  %v1931_v7 = vpack.c.bf16 %v1171_v6, %v1170_v4  ;;  %v1872_v4 = vpack.c.bf16 %v962_v16, %v960_v2  ;;  %v959_v6 = vld [vmem:[%s3553_s3 + $0x260] sm:$0xff] }
 0x1b1   :  { %1929 = vmatpush1.bf16.msra.mxu1 %v1928_v3  ;;  %v1870_v3 = vpack.c.bf16 %v957_v63, %v955_v62  ;;  %v996_v62 = vld [vmem:[%s3553_s3 + $0x388] sm:$0xff]  ;;  %v998_v63 = vld [vmem:[%s3553_s3 + $0x398] sm:$0xff] }
 0x1b2   :  { %1831 = vmatpush1.bf16.msra.mxu0 %v1830_v12  ;;  %1930 = vmatprep.subr.bf16.mxu1 %v2141_v1  ;;  %v1175_v12 = vld [vmem:[%s3554_s4 + $0x48] sm:$0xff]  ;;  %v1908_v16 = vpack.c.bf16 %v998_v63, %v996_v62 }
 0x1b3   :  { %1833 = vmatprep.subr.bf16.mxu0 %v1832_v13  ;;  %v1937_v13 = vpack.c.bf16 %v1175_v12, %v1174_v11  ;;  %v1876_v11 = vpack.c.bf16 %v966_v9, %v964_v8  ;;  %v963_v12 = vld [vmem:[%s3553_s3 + $0x280] sm:$0xff]  ;;  %v586_v8 = vrot.slane %v3320_v34, %v160_v27 }
 0x1b5   :  { %1932 = vmatpush1.bf16.msra.mxu1 %v1931_v7  ;;  %v961_v7 = vld [vmem:[%s3553_s3 + $0x270] sm:$0xff] }
 0x1b6   :  { %1835 = vmatpush1.bf16.msra.mxu0 %v1834_v19  ;;  %1933 = vmatprep.subr.bf16.mxu1 %v2141_v1  ;;  %v1179_v19 = vld [vmem:[%s3554_s4 + $0x68] sm:$0xff] }
 0x1b7   :  { %1837 = vmatprep.subr.bf16.mxu0 %v1836_v20  ;;  %v1943_v20 = vpack.c.bf16 %v1179_v19, %v1178_v18  ;;  %v1880_v18 = vpack.c.bf16 %v970_v15, %v968_v14  ;;  %v967_v19 = vld [vmem:[%s3553_s3 + $0x2a0] sm:$0xff] }
 0x1b8   :  { %v1003_v15 = vld [vmem:[%s3553_s3 + $0x3c0] sm:$0xff] }
 0x1b9   :  { %1935 = vmatpush1.bf16.msra.mxu1 %v1934_v10  ;;  %v1874_v10 = vpack.c.bf16 %v961_v7, %v959_v6  ;;  %v1000_v6 = vld [vmem:[%s3553_s3 + $0x3a8] sm:$0xff]  ;;  %v1002_v7 = vld [vmem:[%s3553_s3 + $0x3b8] sm:$0xff] }
 0x1ba   :  { %1839 = vmatpush1.bf16.msra.mxu0 %v1838_v25  ;;  %1936 = vmatprep.subr.bf16.mxu1 %v2141_v1  ;;  %v1183_v25 = vld [vmem:[%s3554_s4 + $0x88] sm:$0xff] }
 0x1bb   :  { %1841 = vmatprep.subr.bf16.mxu0 %v1840_v26  ;;  %v1949_v26 = vpack.c.bf16 %v1183_v25, %v1182_v24  ;;  %v1884_v24 = vpack.c.bf16 %v974_v22, %v972_v21  ;;  %v971_v25 = vld [vmem:[%s3553_s3 + $0x2c0] sm:$0xff]  ;;  %v1009_v22 = vld [vmem:[%s3553_s3 + $0x3f0] sm:$0xff] }
 0x1bc   :  { %v1007_v21 = vld [vmem:[%s3553_s3 + $0x3e0] sm:$0xff] }
 0x1bd   :  { %1938 = vmatpush1.bf16.msra.mxu1 %v1937_v13  ;;  %v965_v13 = vld [vmem:[%s3553_s3 + $0x290] sm:$0xff] }
 0x1be   :  { %1843 = vmatpush1.bf16.msra.mxu0 %v1842_v32  ;;  %1939 = vmatprep.subr.bf16.mxu1 %v2141_v1  ;;  %v1187_v32 = vld [vmem:[%s3554_s4 + $0xa8] sm:$0xff] }
 0x1bf   :  { %1845 = vmatprep.subr.bf16.mxu0 %v1844_v33  ;;  %v1955_v33 = vpack.c.bf16 %v1187_v32, %v1186_v31  ;;  %v1888_v31 = vpack.c.bf16 %v978_v29, %v976_v28  ;;  %v975_v32 = vld [vmem:[%s3553_s3 + $0x2e0] sm:$0xff] }
 0x1c0   :  { %v1012_v29 = vld [vmem:[#allocation8 + $0x2] ss:$8 sm:$0x3] }
 0x1c1   :  { %1941 = vmatpush1.bf16.msra.mxu1 %v1940_v17  ;;  %v1878_v17 = vpack.c.bf16 %v965_v13, %v963_v12  ;;  %v1001_v12 = vld [vmem:[%s3553_s3 + $0x3b0] sm:$0xff]  ;;  %v1004_v13 = vld [vmem:[%s3553_s3 + $0x3c8] sm:$0xff] }
 0x1c2   :  { %1847 = vmatpush1.bf16.msra.mxu0 %v1846_v36  ;;  %1942 = vmatprep.subr.bf16.mxu1 %v2141_v1  ;;  %v582_v36 = vrot.slane %v3320_v34, %v2656_v49  ;;  %v1916_v14 = vpack.c.bf16 %v1006_v46, %v1004_v13 }
 0x1c3   :  { %1849 = vmatprep.subr.bf16.mxu0 %v1848_v39 }
 0x1c5   :  { %1944 = vmatpush1.bf16.msra.mxu1 %v1943_v20  ;;  %v969_v20 = vld [vmem:[%s3553_s3 + $0x2b0] sm:$0xff] }
 0x1c6   :  { %1851 = vmatpush1.bf16.msra.mxu0 %v1850_v42  ;;  %1945 = vmatprep.subr.bf16.mxu1 %v2141_v1 }
 0x1c7   :  { %1853 = vmatprep.subr.bf16.mxu0 %v1852_v48  ;;  %v949_v48 = vld [vmem:[%s3553_s3 + $0x210] sm:$0xff] }
 0x1c8   :  { %v1862_v51 = vpack.c.bf16 %v949_v48, %v947_v45  ;;  %v983_v48 = vld [vmem:[%s3553_s3 + $0x320] sm:$0xff] }
 0x1c9   :  { %1947 = vmatpush1.bf16.msra.mxu1 %v1946_v23  ;;  %v1882_v23 = vpack.c.bf16 %v969_v20, %v967_v19 }
 0x1ca   :  { %1855 = vmatpush1.bf16.msra.mxu0 %v1854_v54  ;;  %1948 = vmatprep.subr.bf16.mxu1 %v2141_v1  ;;  %v1864_v54 = vpack.c.bf16 %v954_v50, %v952_v52  ;;  %v985_v52 = vld [vmem:[%s3553_s3 + $0x330] sm:$0xff]  ;;  %v988_v50 = vld [vmem:[%s3553_s3 + $0x348] sm:$0xff] }
 0x1cb   :  { %1857 = vmatprep.subr.bf16.mxu0 %v1856_v55  ;;  %v951_v55 = vld [vmem:[%s3553_s3 + $0x220] sm:$0xff] }
 0x1cd   :  { %1950 = vmatpush1.bf16.msra.mxu1 %v1949_v26  ;;  %v973_v26 = vld [vmem:[%s3553_s3 + $0x2d0] sm:$0xff] }
 0x1ce   :  { %1859 = vmatpush1.bf16.msra.mxu0 %v1858_v58  ;;  %1951 = vmatprep.subr.bf16.mxu1 %v2141_v1  ;;  %v956_v58 = vld [vmem:[%s3553_s3 + $0x248] sm:$0xff] }
 0x1cf   :  { %1861 = vmatprep.subr.bf16.mxu0 %v1860_v61  ;;  %v1866_v61 = vpack.c.bf16 %v953_v56, %v951_v55  ;;  %v1868_v5 = vpack.c.bf16 %v958_v59, %v956_v58  ;;  %v987_v55 = vld [vmem:[%s3553_s3 + $0x340] sm:$0xff]  ;;  %v989_v56 = vld [vmem:[%s3553_s3 + $0x350] sm:$0xff]  ;;  %v994_v58 = vld [vmem:[%s3553_s3 + $0x378] sm:$0xff] }
 0x1d0   :  { %v1902_v59 = vpack.c.bf16 %v989_v56, %v987_v55  ;;  %v1269_v55 = vld [vmem:[#allocation8 + $0x4] ss:$0 sm:$0xff] }
 0x1d1   :  { %1953 = vmatpush1.bf16.msra.mxu1 %v1952_v30  ;;  %v1886_v30 = vpack.c.bf16 %v973_v26, %v971_v25  ;;  %v1188_v25 = vld [vmem:[%s3554_s4 + $0xb0] sm:$0xff]  ;;  %v1189_v26 = vld [vmem:[%s3554_s4 + $0xb8] sm:$0xff] }
 0x1d2   :  { %1954 = vmatprep.subr.bf16.mxu1 %v2141_v1  ;;  %v1958_v28 = vpack.c.bf16 %v1189_v26, %v1188_v25 }
 0x1d5   :  { %1956 = vmatpush1.bf16.msra.mxu1 %v1955_v33  ;;  %v977_v33 = vld [vmem:[%s3553_s3 + $0x2f0] sm:$0xff] }
 0x1d6   :  { %1957 = vmatprep.subr.bf16.mxu1 %v2141_v1 }
 0x1d9   :  { %1959 = vmatpush1.bf16.msra.mxu1 %v1958_v28 }
 0x1da   :  { %1960 = vmatprep.subr.bf16.mxu1 %v2141_v1 }
 0x264   :  { %v732_v38 = vpop.f32.mrb[0].mxu0  ;;  %v3330_v39 = vpop.f32.mrb[4].mxu1 }
 0x265   :  { %v734_v40 = vpop.f32.mrb[1].mxu0  ;;  %v876_v41 = vpop.f32.mrb[5].mxu1  ;;  %v1972_v42 = vadd.f32 %v732_v38, %v578_v35  ;;  %v980_v35 = vld [vmem:[%s3553_s3 + $0x308] sm:$0xff]  ;;  %v1974_v27 = vadd.f32 %v3330_v39, %v586_v8  ;;  %v1010_v39 = vld [vmem:[%s3553_s3 + $0x3f8] sm:$0xff] }
 0x266   :  { %v1973_v43 = vadd.f32 %v734_v40, %v582_v36  ;;  %v1975_v44 = vadd.f32 %v876_v41, %v590_v37  ;;  %v982_v36 = vld [vmem:[%s3553_s3 + $0x318] sm:$0xff]  ;;  %v1890_v37 = vpack.c.bf16 %v977_v33, %v975_v32  ;;  %v979_v40 = vld [vmem:[%s3553_s3 + $0x300] sm:$0xff]  ;;  %v981_v41 = vld [vmem:[%s3553_s3 + $0x310] sm:$0xff] }
 0x267   :  { %v1892_v38 = vpack.c.bf16 %v982_v36, %v980_v35  ;;  %v1265_v32 = vld [vmem:[#allocation5] sm:$0xff]  ;;  %v1266_v33 = vld [vmem:[#allocation5 + $0x8] sm:$0xff] }
 0x268   :  { %2004 = vtanh.f32 %v1973_v43  ;;  %v986_v43 = vld [vmem:[%s3553_s3 + $0x338] sm:$0xff] }
 0x269   :  { %2006 = vtanh.f32 %v1972_v42  ;;  %v984_v42 = vld [vmem:[%s3553_s3 + $0x328] sm:$0xff] }
 0x26a   :  { %2008 = vtanh.f32 %v1975_v44  ;;  %v1894_v44 = vpack.c.bf16 %v981_v41, %v979_v40  ;;  %v1896_v45 = vpack.c.bf16 %v986_v43, %v984_v42  ;;  %v1267_v41 = vld [vmem:[#allocation5 + $0x10] sm:$0xff]  ;;  %v1268_v42 = vld [vmem:[#allocation5 + $0x18] sm:$0xff] }
 0x26b   :  { %2010 = vtanh.f32 %v1974_v27  ;;  %v1964_v43 = vpack.c.bf16 %v1268_v42, %v1267_v41 }
 0x272   :  { %v2005_v53 = vpop.eup %2004 }
 0x273   :  { %v2007_v57 = vpop.eup %2006  ;;  %1088 = vmatprep.mubr.f32.mxu0 %v2005_v53  ;;  %v1898_v53 = vpack.c.bf16 %v985_v52, %v983_v48  ;;  %v1345_v48 = vld [vmem:[#allocation7] sm:$0xff]  ;;  %v1346_v52 = vld [vmem:[#allocation7 + $0x8] sm:$0xff] }
 0x274   :  { %v2009_v60 = vpop.eup %2008  ;;  %1089 = vmatmul.mubr.f32.vlgmr.msra.gmra.mrb[2].mxu0 %v2007_v57  ;;  %v992_v57 = vld [vmem:[%s3553_s3 + $0x368] sm:$0xff] }
 0x275   :  { %1863 = vmatpush1.bf16.msra.mxu0 %v1862_v51  ;;  %1159 = vmatprep.mubr.f32.mxu0 %v2009_v60  ;;  %v990_v51 = vld [vmem:[%s3553_s3 + $0x358] sm:$0xff]  ;;  %v1904_v60 = vpack.c.bf16 %v994_v58, %v992_v57 }
 0x276   :  { %1865 = vmatprep.subr.bf16.mxu0 %v1864_v54  ;;  %v1900_v54 = vpack.c.bf16 %v990_v51, %v988_v50  ;;  %v1347_v50 = vld [vmem:[#allocation7 + $0x10] sm:$0xff]  ;;  %v1967_v51 = vpack.c.bf16 %v1346_v52, %v1345_v48 }
 0x279   :  { %1867 = vmatpush1.bf16.msra.mxu0 %v1866_v61  ;;  %v991_v61 = vld [vmem:[%s3553_s3 + $0x360] sm:$0xff] }
 0x27a   :  { %1869 = vmatprep.subr.bf16.mxu0 %v1868_v5  ;;  %v993_v5 = vld [vmem:[%s3553_s3 + $0x370] sm:$0xff] }
 0x27b   :  { %v1906_v2 = vpack.c.bf16 %v993_v5, %v991_v61 }
 0x27d   :  { %1871 = vmatpush1.bf16.msra.mxu0 %v1870_v3  ;;  %v995_v3 = vld [vmem:[%s3553_s3 + $0x380] sm:$0xff] }
 0x27e   :  { %1873 = vmatprep.subr.bf16.mxu0 %v1872_v4  ;;  %v997_v4 = vld [vmem:[%s3553_s3 + $0x390] sm:$0xff] }
 0x27f   :  { %v1910_v9 = vpack.c.bf16 %v997_v4, %v995_v3 }
 0x281   :  { %1875 = vmatpush1.bf16.msra.mxu0 %v1874_v10  ;;  %v1912_v10 = vpack.c.bf16 %v1002_v7, %v1000_v6 }
 0x282   :  { %1877 = vmatprep.subr.bf16.mxu0 %v1876_v11  ;;  %v999_v11 = vld [vmem:[%s3553_s3 + $0x3a0] sm:$0xff] }
 0x283   :  { %v1914_v34 = vpack.c.bf16 %v1001_v12, %v999_v11 }
 0x285   :  { %1879 = vmatpush1.bf16.msra.mxu0 %v1878_v17  ;;  %v1005_v17 = vld [vmem:[%s3553_s3 + $0x3d0] sm:$0xff] }
 0x286   :  { %1881 = vmatprep.subr.bf16.mxu0 %v1880_v18  ;;  %v1008_v18 = vld [vmem:[%s3553_s3 + $0x3e8] sm:$0xff]  ;;  %v1918_v19 = vpack.c.bf16 %v1005_v17, %v1003_v15  ;;  %s2143_s3 = smov [#allocation10]  }
 0x287   :  { %v1920_v20 = vpack.c.bf16 %v1010_v39, %v1008_v18  ;;  %s1430_s4 = sshll.u32 %s2143_s3, 4  ;;  %s1431_s4 = int_to_ptr.vmem [resolvable:$true] %s1430_s4 }
 0x288   :  { %s2102_s6 = scalar_lea.vmem %s1431_s4, 32  ;;  %p2107_p5 = scmp.lt.s32.totalorder %s1431_s4, %s1431_s4 }
 0x289   :  { %1883 = vmatpush1.bf16.msra.mxu0 %v1882_v23  ;;  %v1922_v23 = vpack.c.bf16 %v1009_v22, %v1007_v21  ;;  %p2103_p4 = scmp.ne.s32.totalorder %s1431_s4, %s2102_s6  ;;  %p2108_p6 = scmp.lt.s32.totalorder %s2102_s6, %s2102_s6 }
 0x28a   :  { %1885 = vmatprep.subr.bf16.mxu0 %v1884_v24  ;;  %v2011_v24 = vpop.eup %2010 }
 0x28b   :  { %p2109_p7 = por %p2108_p6, %p2107_p5 }
 0x28d   :  { %1887 = vmatpush1.bf16.msra.mxu0 %v1886_v30  ;;  %v1021_v30 = vrot.slane %v1012_v29, %v2656_v49  ;;  %p2110_p8 = pnand %p2109_p7, %p2103_p4 }
 0x28e   :  { %1889 = vmatprep.subr.bf16.mxu0 %v1888_v31  ;;  %v1017_v31 = vrot.slane %v1012_v29, %v2651_v47  ;;  %v1190_v47 = vld [vmem:[#allocation8 + $0x3] ss:$0 sm:$0xff] }
 0x291   :  { %1891 = vmatpush1.bf16.msra.mxu0 %v1890_v37 }
 0x292   :  { %1893 = vmatprep.subr.bf16.mxu0 %v1892_v38  ;;  %v1961_v38 = vpack.c.bf16 %v1266_v33, %v1265_v32 }
 0x295   :  { %1895 = vmatpush1.bf16.msra.mxu0 %v1894_v44 }
 0x296   :  { %1897 = vmatprep.subr.bf16.mxu0 %v1896_v45 }
 0x299   :  { %1899 = vmatpush1.bf16.msra.mxu0 %v1898_v53  ;;  %v1348_v53 = vld [vmem:[#allocation7 + $0x18] sm:$0xff] }
 0x29a   :  { %1901 = vmatprep.subr.bf16.mxu0 %v1900_v54  ;;  %v1970_v54 = vpack.c.bf16 %v1348_v53, %v1347_v50 }
 0x29d   :  { %1903 = vmatpush1.bf16.msra.mxu0 %v1902_v59 }
 0x29e   :  { %1905 = vmatprep.subr.bf16.mxu0 %v1904_v60  ;;  %v1349_v60 = vld [vmem:[#allocation8 + $0x5] ss:$0 sm:$0xff] }
 0x2a1   :  { %1907 = vmatpush1.bf16.msra.mxu0 %v1906_v2 }
 0x2a2   :  { %1909 = vmatprep.subr.bf16.mxu0 %v1908_v16 }
 0x2a5   :  { %1911 = vmatpush1.bf16.msra.mxu0 %v1910_v9 }
 0x2a6   :  { %1913 = vmatprep.subr.bf16.mxu0 %v1912_v10 }
 0x2a9   :  { %1915 = vmatpush1.bf16.msra.mxu0 %v1914_v34 }
 0x2aa   :  { %1917 = vmatprep.subr.bf16.mxu0 %v1916_v14 }
 0x2ad   :  { %1919 = vmatpush1.bf16.msra.mxu0 %v1918_v19 }
 0x2ae   :  { %1921 = vmatprep.subr.bf16.mxu0 %v1920_v20 }
 0x2b1   :  { %1923 = vmatpush1.bf16.msra.mxu0 %v1922_v23 }
 0x2b4   :  { %1160 = vmatmul.mubr.f32.vlgmr.msra.gmra.mrb[2].mxu0 %v2011_v24 }
 0x387   :  { %v1161_v35 = vpop.f32.mrb[2].mxu0 }
 0x388   :  { %v1163_v36 = vpop.f32.mrb[3].mxu0  ;;  %v1976_v40 = vadd.f32 %v1161_v35, %v1017_v31 }
 0x389   :  { %v1977_v37 = vadd.f32 %v1163_v36, %v1021_v30 }
 0x38b   :  { %1441 = vmatprep.mubr.msk.f32.mxu1 %vm1191_vm0, %v1977_v37 }
 0x38c   :  { %1260 = vmatmul.mubr.f32.vlgmr.msra.gmra.mrb[6].mxu1 %v1976_v40 }
 0x38d   :  { %1962 = vmatpush3.bf16.msra.mxu1 %v1961_v38  ;;  %1462 = vmatprep.mubr.msk.f32.mxu1 %vm2142_vm1, %v2140_v0 }
 0x38e   :  { %1963 = vmatprep.subr.bf16.mxu1 %v2141_v1 }
 0x391   :  { %1965 = vmatpush3.bf16.msra.mxu1 %v1964_v43 }
 0x392   :  { %1966 = vmatprep.subr.bf16.mxu1 %v2141_v1 }
 0x45f   :  { %v1261_v49 = vpop.f32.mrb[6].mxu1 }
 0x460   :  { %v1262_v44 = vadd.f32 %v1261_v49, %v1190_v47  ;;  %v1263_v45 = vpop.f32.mrb[7].mxu1 }
 0x462   :  { %1463 = vmatmul.mubr.msk.f32.vlgmr.msra.gmra.mrb[8].mxu1 %vm1270_vm2, %v1262_v44 }
 0x463   :  { %1473 = vmatprep.mubr.msk.f32.mxu1 %vm2142_vm1, %v2140_v0  ;;  %1968 = vmatpush3.bf16.msra.mxu1 %v1967_v51 }
 0x464   :  { %1969 = vmatprep.subr.bf16.mxu1 %v2141_v1 }
 0x467   :  { %1971 = vmatpush3.bf16.msra.mxu1 %v1970_v54 }
 0x535   :  { %v1340_v56 = vpop.f32.mrb[8].mxu1 }
 0x536   :  { %v1341_v57 = vadd.f32 %v1340_v56, %v1269_v55  ;;  %v1464_v58 = vpop.f32.mrb[9].mxu1 }
 0x538   :  { %2012 = vtanh.f32 %v1341_v57 }
 0x542   :  { %v2013_v59 = vpop.eup %2012 }
 0x543   :  { %1474 = vmatmul.mubr.msk.f32.vlgmr.msra.gmra.mrb[10].mxu1 %vm1270_vm2, %v2013_v59 }
 0x616   :  { %v1419_v0 = vpop.f32.mrb[10].mxu1 }
 0x617   :  { %v1420_v61 = vadd.f32 %v1419_v0, %v1349_v60  ;;  %v1475_v5 = vpop.f32.mrb[11].mxu1 }
 0x619   :  { %1423 = vst [vmem:[#allocation10] sm:$0x3] %v1420_v61 }
 0x61a   :  { %2113 = shalt.err (!%p2110_p8)
}
 0x61b   :  { %s2114_s16 = scalar_lea.hbm %s3558_s8, 32 }
 0x61c   :  { %p2115_p9 = scmp.ne.s32.totalorder %s3558_s8, %s2114_s16  ;;  %p2118_p10 = scmp.lt.u32.totalorder %s2114_s16, %s3558_s8 }
 0x61e   :  { %p2120_p11 = pnand %p2118_p10, %p2115_p9 }
 0x620   :  { %2123 = shalt.err (!%p2120_p11)
}
 0x621   :  { %1433 = dma.vmem_to_hbm [thread:$0]  %s1431_s4, 32, %s3558_s8, [#allocation4]  }
 0x622   :  { %2130 = dma.done.wait [#allocation4], 32  }
 0x623   :  { %2131 = vsyncadd [#allocation4], 4294967264 }
 0x624   :  { %1437 = vsyncpa [#allocation3], 1 }
 0x625   :  { %1438 = vsyncpa [#allocation6], 1 }
 0x626   :  { %1439 = vsyncpa [#allocation9], 1 }
 0x627   :  { %1440 = vsyncpa [#allocation4], 1 }

</bundles_post_ra>
